<compile_context>
chip_gen: v7x
topology: tpu7x:2x2x1
jax: 0.10.0
libtpu: 0.0.40
codegen_flags: <defaults>
</compile_context>

<pallas_src>
import functools

import jax
import jax.numpy as jnp
import numpy as np
from jax import lax
from jax.experimental import pallas as pl
from jax.experimental.pallas import tpu as pltpu


def _round_up(a: int, b: int) -> int:
    return (a + b - 1) // b * b


# ----------------------------------------------------------------------------
# Phase 1: in-kernel tap formation + conv (K*K bf16 MXU matmuls into an f32
# VMEM accumulator) + per-tile BN partial statistics.
# ----------------------------------------------------------------------------
def _conv_stats_kernel(x_ref, w_ref, mask_ref, conv_ref, sum_ref, ssq_ref,
                       acc_ref, *, k, wp, tb, r_img):
    # x_ref    : (TB, Hp*Wp, Cin)  bf16   flattened padded activation tile
    # w_ref    : (K*K, Cin, Cpad)  bf16   resident weight taps
    # mask_ref : (H*Wp, 1)         f32    1.0 on valid output columns (w < W)
    # conv_ref : (TB, H*Wp, Cpad)  bf16   conv intermediate (junk cols zeroed)
    # sum_ref  : (1, 1, Cpad)      f32    per-tile sum   over valid positions
    # ssq_ref  : (1, 1, Cpad)      f32    per-tile sumsq over valid positions
    # acc_ref  : (H*Wp, Cpad)      f32    scratch accumulator (reused per image)
    mask = mask_ref[...]                                  # (H*Wp, 1)
    s_tot = None
    ss_tot = None
    for b in range(tb):                                   # static unroll
        for t in range(k * k):                            # static unroll (<=9)
            dy, dx = divmod(t, k)
            # Tap (dy, dx): contiguous slice of the flat padded image; row
            # h*Wp + w of the slice is exactly x_pad[h+dy, w+dx, :].
            xs = x_ref[b, pl.ds(dy * wp + dx, r_img), :]  # (H*Wp, Cin) bf16
            contrib = jnp.dot(xs, w_ref[t],
                              preferred_element_type=jnp.float32)
            if t == 0:
                acc_ref[...] = contrib
            else:
                acc_ref[...] += contrib
        # Zero the junk columns (w >= W) so they contribute nothing to the
        # statistics and the stored intermediate stays clean.
        a = acc_ref[...] * mask                           # (H*Wp, Cpad) f32
        conv_ref[b, :, :] = a.astype(conv_ref.dtype)      # bf16 intermediate
        s = jnp.sum(a, axis=0, keepdims=True)             # (1, Cpad)
        ss = jnp.sum(a * a, axis=0, keepdims=True)        # (1, Cpad)
        s_tot = s if s_tot is None else s_tot + s
        ss_tot = ss if ss_tot is None else ss_tot + ss
    sum_ref[...] = s_tot[None]                            # (1, 1, Cpad)
    ssq_ref[...] = ss_tot[None]


# ----------------------------------------------------------------------------
# Phase 2: apply precomputed scale/shift (gamma=1 BN + beta), optional ReLU.
# ----------------------------------------------------------------------------
def _bn_beta_relu_kernel(conv_ref, scale_ref, shift_ref, o_ref, *, relu, tb):
    # conv_ref : (TB, H*Wp, Cpad) bf16   scale/shift : (1, Cpad) f32 (resident)
    scale = scale_ref[...]
    shift = shift_ref[...]
    for b in range(tb):                                   # static unroll
        y = conv_ref[b, :, :].astype(jnp.float32) * scale + shift
        if relu:
            y = jnp.maximum(y, 0.0)
        o_ref[b, :, :] = y


def conv_block_forward_nhwc(x_nhwc, weight, beta, *, kernel_size, relu=True,
                            eps=1e-5, images_per_tile=8):
    """NHWC-native ConvBlock forward.

    x_nhwc: (N, H, W, Cin) f32.  weight: (Cout, Cin, K, K).  beta: (Cout,).
    Returns (N, H, W, Cout) f32.
    """
    assert kernel_size in (1, 3)
    N, H, W, Cin = x_nhwc.shape
    Cout = weight.shape[0]
    K = kernel_size
    pad = K // 2

    Wp = W + 2 * pad                       # padded width (= junk-col stride)
    extra = (K - 1 + Wp - 1) // Wp         # extra zero rows so tap slices fit
    Hp = H + 2 * pad + extra
    S = Hp * Wp                            # flat padded spatial length
    R_img = H * Wp                         # accumulator rows per image
    Cpad = max(_round_up(Cout, 128), 128)  # lane-dense output channels

    TB = max(1, min(images_per_tile, N))   # images per grid step
    N_pad = _round_up(N, TB)
    G = N_pad // TB

    # ---- XLA glue: pad + flatten activation (bf16 MXU operands) -------------
    # Appended zero images contribute exactly zero conv outputs and therefore
    # zero partial sums; the count below uses the true N*H*W.
    xp = jnp.pad(x_nhwc, ((0, N_pad - N), (pad, pad + extra), (pad, pad),
                          (0, 0)))
    x3 = xp.reshape(N_pad, S, Cin).astype(jnp.bfloat16)

    # Weight taps (K*K, Cin, Cpad); padded output channels are zero.
    wt = jnp.transpose(weight, (2, 3, 1, 0)).reshape(K * K, Cin, Cout)
    wt = jnp.pad(wt, ((0, 0), (0, 0), (0, Cpad - Cout))).astype(jnp.bfloat16)

    # Valid-output-column mask: row r = h*Wp + w is valid iff w < W.
    col = jnp.arange(R_img, dtype=jnp.int32) % Wp
    row_mask = (col < W).astype(jnp.float32).reshape(R_img, 1)

    compiler_params = pltpu.CompilerParams(
        dimension_semantics=("parallel",),          # shard tiles across TCs
        vmem_limit_bytes=64 * 1024 * 1024,          # per-step use is a few MiB
    )

    # ---- phase 1: conv + per-tile partial sums ------------------------------
    conv_kernel = functools.partial(_conv_stats_kernel, k=K, wp=Wp, tb=TB,
                                    r_img=R_img)
    conv, sums, ssqs = pl.pallas_call(
        conv_kernel,
        grid=(G,),
        in_specs=[
            pl.BlockSpec((TB, S, Cin), lambda i: (i, 0, 0)),        # activation
            pl.BlockSpec((K * K, Cin, Cpad), lambda i: (0, 0, 0)),  # weights
            pl.BlockSpec((R_img, 1), lambda i: (0, 0)),             # col mask
        ],
        out_specs=[
            pl.BlockSpec((TB, R_img, Cpad), lambda i: (i, 0, 0)),   # conv bf16
            pl.BlockSpec((1, 1, Cpad), lambda i: (i, 0, 0)),        # sums
            pl.BlockSpec((1, 1, Cpad), lambda i: (i, 0, 0)),        # sumsqs
        ],
        out_shape=[
            jax.ShapeDtypeStruct((N_pad, R_img, Cpad), jnp.bfloat16),
            jax.ShapeDtypeStruct((G, 1, Cpad), jnp.float32),
            jax.ShapeDtypeStruct((G, 1, Cpad), jnp.float32),
        ],
        scratch_shapes=[pltpu.VMEM((R_img, Cpad), jnp.float32)],
        compiler_params=compiler_params,
    )(x3, wt, row_mask)

    # ---- tiny XLA combine of the G partials (once, not per phase-2 step) ----
    cnt = float(N * H * W)
    s_tot = jnp.sum(sums, axis=(0, 1))                  # (Cpad,)
    ss_tot = jnp.sum(ssqs, axis=(0, 1))
    mean = s_tot / cnt
    var = jnp.maximum(ss_tot / cnt - mean * mean, 0.0)  # biased batch variance
    inv_std = lax.rsqrt(var + eps)
    beta_pad = jnp.pad(beta.astype(jnp.float32), (0, Cpad - Cout))
    scale = inv_std.reshape(1, Cpad)
    shift = (beta_pad - mean * inv_std).reshape(1, Cpad)

    # ---- phase 2: normalize (scale/shift) + ReLU ----------------------------
    bn_kernel = functools.partial(_bn_beta_relu_kernel, relu=relu, tb=TB)
    y3 = pl.pallas_call(
        bn_kernel,
        grid=(G,),
        in_specs=[
            pl.BlockSpec((TB, R_img, Cpad), lambda i: (i, 0, 0)),   # conv bf16
            pl.BlockSpec((1, Cpad), lambda i: (0, 0)),              # scale
            pl.BlockSpec((1, Cpad), lambda i: (0, 0)),              # shift
        ],
        out_specs=pl.BlockSpec((TB, R_img, Cpad), lambda i: (i, 0, 0)),
        out_shape=jax.ShapeDtypeStruct((N_pad, R_img, Cpad), jnp.float32),
        compiler_params=compiler_params,
    )(conv, scale, shift)

    # ---- XLA glue: drop padded images / junk columns / padded channels ------
    y = y3[:N].reshape(N, H, Wp, Cpad)[:, :, :W, :Cout]
    return y


def conv_block_forward(x_nchw, weight, beta, *, kernel_size, relu=True,
                       eps=1e-5, images_per_tile=8):
    """Module-boundary wrapper: NCHW in/out to match the PyTorch ConvBlock.

    For a ResNet tower, chain conv_block_forward_nhwc directly and only
    transpose at the model boundaries.
    """
    x_nhwc = jnp.transpose(x_nchw, (0, 2, 3, 1))
    y = conv_block_forward_nhwc(x_nhwc, weight, beta, kernel_size=kernel_size,
                                relu=relu, eps=eps,
                                images_per_tile=images_per_tile)
    return jnp.transpose(y, (0, 3, 1, 2))


if __name__ == "__main__":
    # Small shapes: batch=2, in_channels=4, out_channels=8, spatial=16, k=3.
    N, Cin, Cout, H, W, K = 2, 4, 8, 16, 16, 3

    key = jax.random.PRNGKey(0)
    kx, kw, kb = jax.random.split(key, 3)
    x = jax.random.normal(kx, (N, Cin, H, W), dtype=jnp.float32)

    # kaiming_normal_(mode='fan_out', nonlinearity='relu'): std=sqrt(2/fan_out)
    std = float(np.sqrt(2.0 / (Cout * K * K)))
    weight = jax.random.normal(kw, (Cout, Cin, K, K), dtype=jnp.float32) * std
    # Module initializes beta to zeros; use a nonzero beta to exercise the add.
    beta = jax.random.normal(kb, (Cout,), dtype=jnp.float32) * 0.1

    # images_per_tile=1 -> grid of 2 tiles, exercising the cross-tile BN combine.
    out = conv_block_forward(x, weight, beta, kernel_size=K, relu=True,
                             images_per_tile=1)
    out = jax.block_until_ready(out)

    # Reference: identical math in plain JAX (bf16 conv operands, f32 tap
    # accumulation, E[x^2]-E[x]^2 batch stats, bf16-rounded conv intermediate,
    # scale/shift normalization, beta add, ReLU).
    pad = K // 2
    x_nhwc = jnp.transpose(x, (0, 2, 3, 1))
    xp = jnp.pad(x_nhwc, ((0, 0), (pad, pad), (pad, pad), (0, 0)))
    xpb = xp.astype(jnp.bfloat16).astype(jnp.float32)
    wtb = jnp.transpose(weight, (2, 3, 1, 0)).astype(jnp.bfloat16)
    wtb = wtb.astype(jnp.float32)                       # (K, K, Cin, Cout)
    acc = jnp.zeros((N, H, W, Cout), jnp.float32)
    for dy in range(K):
        for dx in range(K):
            acc = acc + jnp.einsum('nhwc,co->nhwo',
                                   xpb[:, dy:dy + H, dx:dx + W, :],
                                   wtb[dy, dx])
    cnt = float(N * H * W)
    s = jnp.sum(acc, axis=(0, 1, 2))
    ss = jnp.sum(acc * acc, axis=(0, 1, 2))
    mean = s / cnt
    var = jnp.maximum(ss / cnt - mean * mean, 0.0)
    inv_std = lax.rsqrt(var + 1e-5)
    acc_bf = acc.astype(jnp.bfloat16).astype(jnp.float32)
    ref = acc_bf * inv_std + (beta - mean * inv_std)
    ref = jnp.maximum(ref, 0.0)
    ref = jnp.transpose(ref, (0, 3, 1, 2))

    np.testing.assert_allclose(np.asarray(out), np.asarray(ref),
                               atol=2e-3, rtol=2e-3)
    print("KERNEL_OK")
</pallas_src>

<mosaic_0001>
module attributes {stable_mosaic.version = 11 : i64} {
  func.func @_conv_stats_kernel(%arg0: i32, %arg1: memref<1x342x4xbf16, #tpu.memory_space<vmem>>, %arg2: memref<9x4x128xbf16, #tpu.memory_space<vmem>>, %arg3: memref<288x1xf32, #tpu.memory_space<vmem>>, %arg4: memref<1x288x128xbf16, #tpu.memory_space<vmem>>, %arg5: memref<1x1x128xf32, #tpu.memory_space<vmem>>, %arg6: memref<1x1x128xf32, #tpu.memory_space<vmem>>, %arg7: memref<288x128xf32, #tpu.memory_space<vmem>>) attributes {dimension_semantics = [#tpu.dimension_semantics<parallel>], iteration_bounds = array<i64: 2>, scalar_prefetch = 0 : i64, scratch_operands = 1 : i64, tpu.core_type = #tpu.core_type<tc>, window_params = [{transform_indices = @transform_0, window_bounds = array<i64: 1, 342, 4>}, {pipeline_mode = #tpu.pipeline_mode<synchronous>, transform_indices = @transform_1, window_bounds = array<i64: 9, 4, 128>}, {pipeline_mode = #tpu.pipeline_mode<synchronous>, transform_indices = @transform_2, window_bounds = array<i64: 288, 1>}, {transform_indices = @transform_3, window_bounds = array<i64: 1, 288, 128>}, {transform_indices = @transform_4, window_bounds = array<i64: 1, 1, 128>}, {transform_indices = @transform_5, window_bounds = array<i64: 1, 1, 128>}]} {
    %c0 = arith.constant 0 : index
    %c0_0 = arith.constant 0 : index
    %0 = vector.load %arg3[%c0, %c0_0] : memref<288x1xf32, #tpu.memory_space<vmem>>, vector<288x1xf32>
    %c0_1 = arith.constant 0 : index
    %c0_2 = arith.constant 0 : index
    %c0_3 = arith.constant 0 : index
    %1 = vector.load %arg1[%c0_1, %c0_2, %c0_3] : memref<1x342x4xbf16, #tpu.memory_space<vmem>>, vector<1x288x4xbf16>
    %2 = vector.shape_cast %1 : vector<1x288x4xbf16> to vector<288x4xbf16>
    %c0_4 = arith.constant 0 : index
    %c0_5 = arith.constant 0 : index
    %c0_6 = arith.constant 0 : index
    %3 = vector.load %arg2[%c0_4, %c0_5, %c0_6] : memref<9x4x128xbf16, #tpu.memory_space<vmem>>, vector<1x4x128xbf16>
    %4 = vector.shape_cast %3 : vector<1x4x128xbf16> to vector<4x128xbf16>
    %cst = arith.constant dense<0.000000e+00> : vector<288x128xf32>
    %5 = tpu.matmul %2, %4, %cst {dimension_numbers = #tpu.dot_dimension_numbers<[1], [0], [0], [1], [0, 0, 1, 1], [], []>} : vector<288x4xbf16>, vector<4x128xbf16>, vector<288x128xf32> -> vector<288x128xf32>
    %c0_7 = arith.constant 0 : index
    %c0_8 = arith.constant 0 : index
    %6 = vector.load %arg7[%c0_7, %c0_8] : memref<288x128xf32, #tpu.memory_space<vmem>>, vector<288x128xf32>
    tpu.vector_store %arg7[%c0_7, %c0_8], %5 {strides = array<i32>} : memref<288x128xf32, #tpu.memory_space<vmem>>, vector<288x128xf32>,
    %c0_9 = arith.constant 0 : index
    %c1 = arith.constant 1 : index
    %c0_10 = arith.constant 0 : index
    %7 = vector.load %arg1[%c0_9, %c1, %c0_10] : memref<1x342x4xbf16, #tpu.memory_space<vmem>>, vector<1x288x4xbf16>
    %8 = vector.shape_cast %7 : vector<1x288x4xbf16> to vector<288x4xbf16>
    %c1_11 = arith.constant 1 : index
    %c0_12 = arith.constant 0 : index
    %c0_13 = arith.constant 0 : index
    %9 = vector.load %arg2[%c1_11, %c0_12, %c0_13] : memref<9x4x128xbf16, #tpu.memory_space<vmem>>, vector<1x4x128xbf16>
    %10 = vector.shape_cast %9 : vector<1x4x128xbf16> to vector<4x128xbf16>
    %cst_14 = arith.constant dense<0.000000e+00> : vector<288x128xf32>
    %11 = tpu.matmul %8, %10, %cst_14 {dimension_numbers = #tpu.dot_dimension_numbers<[1], [0], [0], [1], [0, 0, 1, 1], [], []>} : vector<288x4xbf16>, vector<4x128xbf16>, vector<288x128xf32> -> vector<288x128xf32>
    %c0_15 = arith.constant 0 : index
    %c0_16 = arith.constant 0 : index
    %12 = vector.load %arg7[%c0_15, %c0_16] : memref<288x128xf32, #tpu.memory_space<vmem>>, vector<288x128xf32>
    %13 = arith.addf %12, %11 : vector<288x128xf32>
    %c0_17 = arith.constant 0 : index
    %c0_18 = arith.constant 0 : index
    %14 = vector.load %arg7[%c0_17, %c0_18] : memref<288x128xf32, #tpu.memory_space<vmem>>, vector<288x128xf32>
    tpu.vector_store %arg7[%c0_17, %c0_18], %13 {strides = array<i32>} : memref<288x128xf32, #tpu.memory_space<vmem>>, vector<288x128xf32>,
    %c0_19 = arith.constant 0 : index
    %c2 = arith.constant 2 : index
    %c0_20 = arith.constant 0 : index
    %15 = vector.load %arg1[%c0_19, %c2, %c0_20] : memref<1x342x4xbf16, #tpu.memory_space<vmem>>, vector<1x288x4xbf16>
    %16 = vector.shape_cast %15 : vector<1x288x4xbf16> to vector<288x4xbf16>
    %c2_21 = arith.constant 2 : index
    %c0_22 = arith.constant 0 : index
    %c0_23 = arith.constant 0 : index
    %17 = vector.load %arg2[%c2_21, %c0_22, %c0_23] : memref<9x4x128xbf16, #tpu.memory_space<vmem>>, vector<1x4x128xbf16>
    %18 = vector.shape_cast %17 : vector<1x4x128xbf16> to vector<4x128xbf16>
    %cst_24 = arith.constant dense<0.000000e+00> : vector<288x128xf32>
    %19 = tpu.matmul %16, %18, %cst_24 {dimension_numbers = #tpu.dot_dimension_numbers<[1], [0], [0], [1], [0, 0, 1, 1], [], []>} : vector<288x4xbf16>, vector<4x128xbf16>, vector<288x128xf32> -> vector<288x128xf32>
    %c0_25 = arith.constant 0 : index
    %c0_26 = arith.constant 0 : index
    %20 = vector.load %arg7[%c0_25, %c0_26] : memref<288x128xf32, #tpu.memory_space<vmem>>, vector<288x128xf32>
    %21 = arith.addf %20, %19 : vector<288x128xf32>
    %c0_27 = arith.constant 0 : index
    %c0_28 = arith.constant 0 : index
    %22 = vector.load %arg7[%c0_27, %c0_28] : memref<288x128xf32, #tpu.memory_space<vmem>>, vector<288x128xf32>
    tpu.vector_store %arg7[%c0_27, %c0_28], %21 {strides = array<i32>} : memref<288x128xf32, #tpu.memory_space<vmem>>, vector<288x128xf32>,
    %c0_29 = arith.constant 0 : index
    %c18 = arith.constant 18 : index
    %c0_30 = arith.constant 0 : index
    %23 = vector.load %arg1[%c0_29, %c18, %c0_30] : memref<1x342x4xbf16, #tpu.memory_space<vmem>>, vector<1x288x4xbf16>
    %24 = vector.shape_cast %23 : vector<1x288x4xbf16> to vector<288x4xbf16>
    %c3 = arith.constant 3 : index
    %c0_31 = arith.constant 0 : index
    %c0_32 = arith.constant 0 : index
    %25 = vector.load %arg2[%c3, %c0_31, %c0_32] : memref<9x4x128xbf16, #tpu.memory_space<vmem>>, vector<1x4x128xbf16>
    %26 = vector.shape_cast %25 : vector<1x4x128xbf16> to vector<4x128xbf16>
    %cst_33 = arith.constant dense<0.000000e+00> : vector<288x128xf32>
    %27 = tpu.matmul %24, %26, %cst_33 {dimension_numbers = #tpu.dot_dimension_numbers<[1], [0], [0], [1], [0, 0, 1, 1], [], []>} : vector<288x4xbf16>, vector<4x128xbf16>, vector<288x128xf32> -> vector<288x128xf32>
    %c0_34 = arith.constant 0 : index
    %c0_35 = arith.constant 0 : index
    %28 = vector.load %arg7[%c0_34, %c0_35] : memref<288x128xf32, #tpu.memory_space<vmem>>, vector<288x128xf32>
    %29 = arith.addf %28, %27 : vector<288x128xf32>
    %c0_36 = arith.constant 0 : index
    %c0_37 = arith.constant 0 : index
    %30 = vector.load %arg7[%c0_36, %c0_37] : memref<288x128xf32, #tpu.memory_space<vmem>>, vector<288x128xf32>
    tpu.vector_store %arg7[%c0_36, %c0_37], %29 {strides = array<i32>} : memref<288x128xf32, #tpu.memory_space<vmem>>, vector<288x128xf32>,
    %c0_38 = arith.constant 0 : index
    %c19 = arith.constant 19 : index
    %c0_39 = arith.constant 0 : index
    %31 = vector.load %arg1[%c0_38, %c19, %c0_39] : memref<1x342x4xbf16, #tpu.memory_space<vmem>>, vector<1x288x4xbf16>
    %32 = vector.shape_cast %31 : vector<1x288x4xbf16> to vector<288x4xbf16>
    %c4 = arith.constant 4 : index
    %c0_40 = arith.constant 0 : index
    %c0_41 = arith.constant 0 : index
    %33 = vector.load %arg2[%c4, %c0_40, %c0_41] : memref<9x4x128xbf16, #tpu.memory_space<vmem>>, vector<1x4x128xbf16>
    %34 = vector.shape_cast %33 : vector<1x4x128xbf16> to vector<4x128xbf16>
    %cst_42 = arith.constant dense<0.000000e+00> : vector<288x128xf32>
    %35 = tpu.matmul %32, %34, %cst_42 {dimension_numbers = #tpu.dot_dimension_numbers<[1], [0], [0], [1], [0, 0, 1, 1], [], []>} : vector<288x4xbf16>, vector<4x128xbf16>, vector<288x128xf32> -> vector<288x128xf32>
    %c0_43 = arith.constant 0 : index
    %c0_44 = arith.constant 0 : index
    %36 = vector.load %arg7[%c0_43, %c0_44] : memref<288x128xf32, #tpu.memory_space<vmem>>, vector<288x128xf32>
    %37 = arith.addf %36, %35 : vector<288x128xf32>
    %c0_45 = arith.constant 0 : index
    %c0_46 = arith.constant 0 : index
    %38 = vector.load %arg7[%c0_45, %c0_46] : memref<288x128xf32, #tpu.memory_space<vmem>>, vector<288x128xf32>
    tpu.vector_store %arg7[%c0_45, %c0_46], %37 {strides = array<i32>} : memref<288x128xf32, #tpu.memory_space<vmem>>, vector<288x128xf32>,
    %c0_47 = arith.constant 0 : index
    %c20 = arith.constant 20 : index
    %c0_48 = arith.constant 0 : index
    %39 = vector.load %arg1[%c0_47, %c20, %c0_48] : memref<1x342x4xbf16, #tpu.memory_space<vmem>>, vector<1x288x4xbf16>
    %40 = vector.shape_cast %39 : vector<1x288x4xbf16> to vector<288x4xbf16>
    %c5 = arith.constant 5 : index
    %c0_49 = arith.constant 0 : index
    %c0_50 = arith.constant 0 : index
    %41 = vector.load %arg2[%c5, %c0_49, %c0_50] : memref<9x4x128xbf16, #tpu.memory_space<vmem>>, vector<1x4x128xbf16>
    %42 = vector.shape_cast %41 : vector<1x4x128xbf16> to vector<4x128xbf16>
    %cst_51 = arith.constant dense<0.000000e+00> : vector<288x128xf32>
    %43 = tpu.matmul %40, %42, %cst_51 {dimension_numbers = #tpu.dot_dimension_numbers<[1], [0], [0], [1], [0, 0, 1, 1], [], []>} : vector<288x4xbf16>, vector<4x128xbf16>, vector<288x128xf32> -> vector<288x128xf32>
    %c0_52 = arith.constant 0 : index
    %c0_53 = arith.constant 0 : index
    %44 = vector.load %arg7[%c0_52, %c0_53] : memref<288x128xf32, #tpu.memory_space<vmem>>, vector<288x128xf32>
    %45 = arith.addf %44, %43 : vector<288x128xf32>
    %c0_54 = arith.constant 0 : index
    %c0_55 = arith.constant 0 : index
    %46 = vector.load %arg7[%c0_54, %c0_55] : memref<288x128xf32, #tpu.memory_space<vmem>>, vector<288x128xf32>
    tpu.vector_store %arg7[%c0_54, %c0_55], %45 {strides = array<i32>} : memref<288x128xf32, #tpu.memory_space<vmem>>, vector<288x128xf32>,
    %c0_56 = arith.constant 0 : index
    %c36 = arith.constant 36 : index
    %c0_57 = arith.constant 0 : index
    %47 = vector.load %arg1[%c0_56, %c36, %c0_57] : memref<1x342x4xbf16, #tpu.memory_space<vmem>>, vector<1x288x4xbf16>
    %48 = vector.shape_cast %47 : vector<1x288x4xbf16> to vector<288x4xbf16>
    %c6 = arith.constant 6 : index
    %c0_58 = arith.constant 0 : index
    %c0_59 = arith.constant 0 : index
    %49 = vector.load %arg2[%c6, %c0_58, %c0_59] : memref<9x4x128xbf16, #tpu.memory_space<vmem>>, vector<1x4x128xbf16>
    %50 = vector.shape_cast %49 : vector<1x4x128xbf16> to vector<4x128xbf16>
    %cst_60 = arith.constant dense<0.000000e+00> : vector<288x128xf32>
    %51 = tpu.matmul %48, %50, %cst_60 {dimension_numbers = #tpu.dot_dimension_numbers<[1], [0], [0], [1], [0, 0, 1, 1], [], []>} : vector<288x4xbf16>, vector<4x128xbf16>, vector<288x128xf32> -> vector<288x128xf32>
    %c0_61 = arith.constant 0 : index
    %c0_62 = arith.constant 0 : index
    %52 = vector.load %arg7[%c0_61, %c0_62] : memref<288x128xf32, #tpu.memory_space<vmem>>, vector<288x128xf32>
    %53 = arith.addf %52, %51 : vector<288x128xf32>
    %c0_63 = arith.constant 0 : index
    %c0_64 = arith.constant 0 : index
    %54 = vector.load %arg7[%c0_63, %c0_64] : memref<288x128xf32, #tpu.memory_space<vmem>>, vector<288x128xf32>
    tpu.vector_store %arg7[%c0_63, %c0_64], %53 {strides = array<i32>} : memref<288x128xf32, #tpu.memory_space<vmem>>, vector<288x128xf32>,
    %c0_65 = arith.constant 0 : index
    %c37 = arith.constant 37 : index
    %c0_66 = arith.constant 0 : index
    %55 = vector.load %arg1[%c0_65, %c37, %c0_66] : memref<1x342x4xbf16, #tpu.memory_space<vmem>>, vector<1x288x4xbf16>
    %56 = vector.shape_cast %55 : vector<1x288x4xbf16> to vector<288x4xbf16>
    %c7 = arith.constant 7 : index
    %c0_67 = arith.constant 0 : index
    %c0_68 = arith.constant 0 : index
    %57 = vector.load %arg2[%c7, %c0_67, %c0_68] : memref<9x4x128xbf16, #tpu.memory_space<vmem>>, vector<1x4x128xbf16>
    %58 = vector.shape_cast %57 : vector<1x4x128xbf16> to vector<4x128xbf16>
    %cst_69 = arith.constant dense<0.000000e+00> : vector<288x128xf32>
    %59 = tpu.matmul %56, %58, %cst_69 {dimension_numbers = #tpu.dot_dimension_numbers<[1], [0], [0], [1], [0, 0, 1, 1], [], []>} : vector<288x4xbf16>, vector<4x128xbf16>, vector<288x128xf32> -> vector<288x128xf32>
    %c0_70 = arith.constant 0 : index
    %c0_71 = arith.constant 0 : index
    %60 = vector.load %arg7[%c0_70, %c0_71] : memref<288x128xf32, #tpu.memory_space<vmem>>, vector<288x128xf32>
    %61 = arith.addf %60, %59 : vector<288x128xf32>
    %c0_72 = arith.constant 0 : index
    %c0_73 = arith.constant 0 : index
    %62 = vector.load %arg7[%c0_72, %c0_73] : memref<288x128xf32, #tpu.memory_space<vmem>>, vector<288x128xf32>
    tpu.vector_store %arg7[%c0_72, %c0_73], %61 {strides = array<i32>} : memref<288x128xf32, #tpu.memory_space<vmem>>, vector<288x128xf32>,
    %c0_74 = arith.constant 0 : index
    %c38 = arith.constant 38 : index
    %c0_75 = arith.constant 0 : index
    %63 = vector.load %arg1[%c0_74, %c38, %c0_75] : memref<1x342x4xbf16, #tpu.memory_space<vmem>>, vector<1x288x4xbf16>
    %64 = vector.shape_cast %63 : vector<1x288x4xbf16> to vector<288x4xbf16>
    %c8 = arith.constant 8 : index
    %c0_76 = arith.constant 0 : index
    %c0_77 = arith.constant 0 : index
    %65 = vector.load %arg2[%c8, %c0_76, %c0_77] : memref<9x4x128xbf16, #tpu.memory_space<vmem>>, vector<1x4x128xbf16>
    %66 = vector.shape_cast %65 : vector<1x4x128xbf16> to vector<4x128xbf16>
    %cst_78 = arith.constant dense<0.000000e+00> : vector<288x128xf32>
    %67 = tpu.matmul %64, %66, %cst_78 {dimension_numbers = #tpu.dot_dimension_numbers<[1], [0], [0], [1], [0, 0, 1, 1], [], []>} : vector<288x4xbf16>, vector<4x128xbf16>, vector<288x128xf32> -> vector<288x128xf32>
    %c0_79 = arith.constant 0 : index
    %c0_80 = arith.constant 0 : index
    %68 = vector.load %arg7[%c0_79, %c0_80] : memref<288x128xf32, #tpu.memory_space<vmem>>, vector<288x128xf32>
    %69 = arith.addf %68, %67 : vector<288x128xf32>
    %c0_81 = arith.constant 0 : index
    %c0_82 = arith.constant 0 : index
    %70 = vector.load %arg7[%c0_81, %c0_82] : memref<288x128xf32, #tpu.memory_space<vmem>>, vector<288x128xf32>
    tpu.vector_store %arg7[%c0_81, %c0_82], %69 {strides = array<i32>} : memref<288x128xf32, #tpu.memory_space<vmem>>, vector<288x128xf32>,
    %c0_83 = arith.constant 0 : index
    %c0_84 = arith.constant 0 : index
    %71 = vector.load %arg7[%c0_83, %c0_84] : memref<288x128xf32, #tpu.memory_space<vmem>>, vector<288x128xf32>
    %72 = vector.broadcast %0 : vector<288x1xf32> to vector<288x128xf32>
    %73 = arith.mulf %71, %72 : vector<288x128xf32>
    %74 = arith.truncf %73 : vector<288x128xf32> to vector<288x128xbf16>
    %c0_85 = arith.constant 0 : index
    %c0_86 = arith.constant 0 : index
    %c0_87 = arith.constant 0 : index
    %75 = vector.load %arg4[%c0_85, %c0_86, %c0_87] : memref<1x288x128xbf16, #tpu.memory_space<vmem>>, vector<1x288x128xbf16>
    %76 = vector.shape_cast %75 : vector<1x288x128xbf16> to vector<288x128xbf16>
    %77 = vector.shape_cast %74 : vector<288x128xbf16> to vector<1x288x128xbf16>
    tpu.vector_store %arg4[%c0_85, %c0_86, %c0_87], %77 {strides = array<i32>} : memref<1x288x128xbf16, #tpu.memory_space<vmem>>, vector<1x288x128xbf16>,
    %cst_88 = arith.constant dense<0.000000e+00> : vector<128xf32>
    %78 = vector.multi_reduction <add>, %73, %cst_88 [0] : vector<288x128xf32> to vector<128xf32>
    %79 = vector.shape_cast %78 : vector<128xf32> to vector<1x128xf32>
    %80 = arith.mulf %73, %73 : vector<288x128xf32>
    %cst_89 = arith.constant dense<0.000000e+00> : vector<128xf32>
    %81 = vector.multi_reduction <add>, %80, %cst_89 [0] : vector<288x128xf32> to vector<128xf32>
    %82 = vector.shape_cast %81 : vector<128xf32> to vector<1x128xf32>
    %83 = vector.shape_cast %79 : vector<1x128xf32> to vector<1x1x128xf32>
    %c0_90 = arith.constant 0 : index
    %c0_91 = arith.constant 0 : index
    %c0_92 = arith.constant 0 : index
    %84 = vector.load %arg5[%c0_90, %c0_91, %c0_92] : memref<1x1x128xf32, #tpu.memory_space<vmem>>, vector<1x1x128xf32>
    tpu.vector_store %arg5[%c0_90, %c0_91, %c0_92], %83 {strides = array<i32>} : memref<1x1x128xf32, #tpu.memory_space<vmem>>, vector<1x1x128xf32>,
    %85 = vector.shape_cast %82 : vector<1x128xf32> to vector<1x1x128xf32>
    %c0_93 = arith.constant 0 : index
    %c0_94 = arith.constant 0 : index
    %c0_95 = arith.constant 0 : index
    %86 = vector.load %arg6[%c0_93, %c0_94, %c0_95] : memref<1x1x128xf32, #tpu.memory_space<vmem>>, vector<1x1x128xf32>
    tpu.vector_store %arg6[%c0_93, %c0_94, %c0_95], %85 {strides = array<i32>} : memref<1x1x128xf32, #tpu.memory_space<vmem>>, vector<1x1x128xf32>,
    return
  }
  func.func @transform_0(%arg0: i32) -> (i32, i32, i32) {
    %c0_i32 = arith.constant 0 : i32
    %c0_i32_0 = arith.constant 0 : i32
    %c0_i32_1 = arith.constant 0 : i32
    return %arg0, %c0_i32, %c0_i32_0 : i32, i32, i32
  }
  func.func @transform_1(%arg0: i32) -> (i32, i32, i32) {
    %c0_i32 = arith.constant 0 : i32
    %c0_i32_0 = arith.constant 0 : i32
    %c0_i32_1 = arith.constant 0 : i32
    %c0_i32_2 = arith.constant 0 : i32
    return %c0_i32, %c0_i32_0, %c0_i32_1 : i32, i32, i32
  }
  func.func @transform_2(%arg0: i32) -> (i32, i32) {
    %c0_i32 = arith.constant 0 : i32
    %c0_i32_0 = arith.constant 0 : i32
    %c0_i32_1 = arith.constant 0 : i32
    return %c0_i32, %c0_i32_0 : i32, i32
  }
  func.func @transform_3(%arg0: i32) -> (i32, i32, i32) {
    %c0_i32 = arith.constant 0 : i32
    %c0_i32_0 = arith.constant 0 : i32
    %c0_i32_1 = arith.constant 0 : i32
    return %arg0, %c0_i32, %c0_i32_0 : i32, i32, i32
  }
  func.func @transform_4(%arg0: i32) -> (i32, i32, i32) {
    %c0_i32 = arith.constant 0 : i32
    %c0_i32_0 = arith.constant 0 : i32
    %c0_i32_1 = arith.constant 0 : i32
    return %arg0, %c0_i32, %c0_i32_0 : i32, i32, i32
  }
  func.func @transform_5(%arg0: i32) -> (i32, i32, i32) {
    %c0_i32 = arith.constant 0 : i32
    %c0_i32_0 = arith.constant 0 : i32
    %c0_i32_1 = arith.constant 0 : i32
    return %arg0, %c0_i32, %c0_i32_0 : i32, i32, i32
  }
}

</mosaic_0001>

<bundles_post_ra>
// kernel: tpu_custom_call.1
= control target key start
LH: loop header
LB: loop body
LE: loop exit
PB: predicated region body
PF: predicated region fallthrough
CT: control target
= control target key end

     0   :  { %11 = vsyncpa [#allocation4], 0  ;;  %s8806_s0 = inlined_call_operand.hbm [shape: bf16[2,342,4], index: 0, kind: input, shape index: {}]   ;;  %s8807_s1 = inlined_call_operand.hbm [shape: bf16[9,4,128], index: 1, kind: input, shape index: {}]   ;;  %s8808_s2 = inlined_call_operand.hbm [shape: f32[288,1], index: 2, kind: input, shape index: {}]   ;;  %s8809_s3 = inlined_call_operand.hbm [shape: bf16[2,288,128], index: 3, kind: output, shape index: {0}]   ;;  %s8810_s4 = inlined_call_operand.hbm [shape: f32[2,1,128], index: 4, kind: output, shape index: {1}]   ;;  %s8811_s5 = inlined_call_operand.hbm [shape: f32[2,1,128], index: 5, kind: output, shape index: {2}]  }
   0x1   :  { %13 = vsyncpa [#allocation4 + $0x1], 0 }
   0x2   :  { %14 = vsyncpa [#allocation7], 0 }
   0x3   :  { %15 = vsyncpa [#allocation5], 0 }
   0x4   :  { %17 = vsyncpa [#allocation5 + $0x1], 0 }
   0x5   :  { %18 = vsyncpa [#allocation11], 0 }
   0x6   :  { %20 = vsyncpa [#allocation11 + $0x1], 0  ;;  %s7805_s18 = smov 0   ;;  %s7807_s19 = smov 0  }
   0x7   :  { %s7809_s20 = smov 0   ;;  %s7811_s21 = smov 0  }
   0x8 LB: > { %s7826_s22 = sadd.s32 4294967295, %s7758_s21   ;;  %s5940_s23 = sadd.s32 4294967294, %s7758_s21   ;;  %s7758_s21 = sphi %s7811_s21, %s8831_s21   ;;  %s7754_s20 = sphi %s7809_s20, %s8830_s20   ;;  %s7750_s19 = sphi %s7807_s19, %s8829_s19   ;;  %s7746_s18 = sphi %s7805_s18, %s8828_s18  }
   0x9   : > { %p46_p0 = scmp.ne.s32.totalorder %s7750_s19, %s7746_s18  ;;  %p8812_p1 = scmp.eq.s32.totalorder %s7826_s22, 0 }
   0xa   : > { %p118_p3 = scmp.eq.s32.totalorder %s5940_s23, 1  ;;  %p5941_p5 = scmp.ge.s32.totalorder %s7758_s21, 1 }
   0xb   : > { %p7837_p4 = por %p8812_p1, %p46_p0  ;;  %p177_p7 = scmp.lt.s32.totalorder %s7758_s21, 3 }
   0xc   : > { %p7842_p6 = por %p118_p3, %p46_p0  ;;  %s7760_s27 = smov [#allocation6]  }
   0xd   : > { %s8815_s24 = scalar_select %p7837_p4, 1, 0 }
   0xe   : > { %s8816_s25 = scalar_select %p7842_p6, 1, 0 }
   0xf   : > { %p7847_p8 = pnand %p5941_p5, %p177_p7  ;;  %s189_s28 = sshll.u32 %s7760_s27, 4  ;;  %s7851_s28 = int_to_ptr.vmem [resolvable:$true] %s189_s28 }
  0x10   : > { %s7761_s30 = smov [#allocation8]   ;;  %s7542_s9 = scalar_lea.hbm %s8807_s1, 288 }
  0x11   : > { %p7299_p9 = pneg %p7847_p8  ;;  %s202_s6 = sshll.u32 %s7761_s30, 4  ;;  %s7862_s6 = int_to_ptr.vmem [resolvable:$true] %s202_s6 }
  0x12   : > { %p7543_p12 = scmp.ne.s32.totalorder %s8807_s1, %s7542_s9  ;;  %p7549_p5 = scmp.lt.u32.totalorder %s7542_s9, %s8807_s1 }
  0x13   : > { %p7858_p11 = pnand %p7299_p9, %p8812_p1 }
  0x15   : > { %p7544_p13 = pneg %p7858_p11 }
  0x17   : > { %p7545_p0 = pnand %p7544_p13, %p7543_p12 }
  0x19   : > { %p7546_p3 = pneg %p7545_p0 }
  0x1b   : > { %p7551_p7 = pnand %p7549_p5, %p7546_p3 }
  0x1d   : > { %7554 = shalt.err (!%p7551_p7)
}
  0x1e   : > { %s7555_s14 = scalar_lea.vmem %s7851_s28, 288  ;;  %p7563_p2 = scmp.lt.s32.totalorder %s7851_s28, %s7851_s28 }
  0x1f   : > { %p7556_p9 = scmp.ne.s32.totalorder %s7851_s28, %s7555_s14  ;;  %p7564_p12 = scmp.lt.s32.totalorder %s7555_s14, %s7555_s14 }
  0x21   : > { %p7558_p10 = pnand %p7556_p9, %p7544_p13  ;;  %p7565_p0 = por %p7564_p12, %p7563_p2 }
  0x23   : > { %p7559_p1 = pneg %p7558_p10 }
  0x25   : > { %p7566_p6 = pnand %p7565_p0, %p7559_p1 }
  0x27   : > { %7569 = shalt.err (!%p7566_p6)
}
  0x28   : > { %s7762_s15 = smov 32   ;;  %s7763_s16 = smov 2  }
  0x29   : > { %7302 = dma.hbm_to_vmem [thread:$0]  (!%p7858_p11), %s8807_s1, 288, %s7851_s28, [#allocation7], %s7762_s15, %s7762_s15, %s7763_s16  }
  0x2a   : > { %s7570_s8 = scalar_lea.hbm %s8808_s2, 4608 }
  0x2b   : > { %p7571_p2 = scmp.ne.s32.totalorder %s8808_s2, %s7570_s8  ;;  %p7577_p10 = scmp.lt.u32.totalorder %s7570_s8, %s8808_s2 }
  0x2d   : > { %p7573_p1 = pnand %p7571_p2, %p7544_p13 }
  0x2f   : > { %p7574_p6 = pneg %p7573_p1 }
  0x31   : > { %p7579_p3 = pnand %p7577_p10, %p7574_p6 }
  0x33   : > { %7582 = shalt.err (!%p7579_p3)
}
  0x34   : > { %s7583_s28 = scalar_lea.vmem %s7862_s6, 4608  ;;  %p7591_p12 = scmp.lt.s32.totalorder %s7862_s6, %s7862_s6 }
  0x35   : > { %p7584_p5 = scmp.ne.s32.totalorder %s7862_s6, %s7583_s28  ;;  %p7592_p0 = scmp.lt.s32.totalorder %s7583_s28, %s7583_s28 }
  0x37   : > { %p7586_p7 = pnand %p7584_p5, %p7544_p13  ;;  %p7593_p2 = por %p7592_p0, %p7591_p12 }
  0x39   : > { %p7587_p9 = pneg %p7586_p7 }
  0x3b   : > { %p7594_p1 = pnand %p7593_p2, %p7587_p9 }
  0x3d   : > { %7597 = shalt.err (!%p7594_p1)
}
  0x3e   : > { %s7764_s13 = smov 128   ;;  %s7765_s14 = smov 8  }
  0x3f   : > { %7305 = dma.hbm_to_vmem [thread:$0]  (!%p7858_p11), %s8808_s2, 4608, %s7862_s6, [#allocation7], %s7764_s13, %s7764_s13, %s7765_s14  }
  0x40   : > { %s7917_s17 = sadd.s32 1, %s7758_s21   ;;  %s33_s30 = sadd.s32 1, %s7754_s20 }
  0x41   : > { %s30_s27 = ssub.s32 %s7758_s21, %s7917_s17  ;;  %p40_p6 = scmp.ne.s32.totalorder %s7754_s20, %s7750_s19 }
  0x42   : > { %p31_p13 = scmp.eq.s32.totalorder %s30_s27, 0  ;;  %p41_p10 = scmp.eq.s32.totalorder %s7758_s21, 0 }
  0x43   : > { %p8819_p5 = scmp.eq.s32.totalorder %s7826_s22, 1  ;;  %p7322_p9 = scmp.lt.s32.totalorder %s7758_s21, 2 }
  0x44   : > { %s7926_s7 = scalar_select %p31_p13, %s7754_s20, %s33_s30  }
  0x45   : > { %p42_p3 = por %p41_p10, %p40_p6  ;;  %p7930_p7 = por %p8819_p5, %p40_p6 }
  0x46   : > { %s216_s29 = sand.u32 1, %s7754_s20   ;;  %s7279_s6 = smul.u32 2752, %s7758_s21 }
  0x47   : > { %s8820_s8 = scalar_select %p7930_p7, 1, 0 }
  0x48   : > { %s7278_s9 = smul.u32 172, %s216_s29  ;;  %p7937_p11 = pnand %p7322_p9, %p42_p3 }
  0x49   : > { %s7944_s28 = scalar_lea.hbm %s8806_s0, %s7279_s6  ;;  %s7948_s15 = scalar_lea.sflag [#allocation4], %s216_s29 }
  0x4a   : > { %s220_s13 = scalar_lea.vmem [#allocation3], %s7278_s9  ;;  %s7598_s16 = scalar_lea.hbm %s7944_s28, 2752 }
  0x4b   : > { %s227_s14 = sshll.u32 %s220_s13, 4  ;;  %p7599_p12 = scmp.ne.s32.totalorder %s7944_s28, %s7598_s16  ;;  %s7946_s14 = int_to_ptr.vmem [resolvable:$true] %s227_s14 }
  0x4c   : > { %p7600_p0 = pneg %p7937_p11  ;;  %s7603_s6 = scalar_lea.hbm %s8806_s0, 5504 }
  0x4d   : > { %p7604_p13 = scmp.lt.u32.totalorder %s7944_s28, %s8806_s0  ;;  %p7605_p6 = scmp.lt.u32.totalorder %s7603_s6, %s7598_s16 }
  0x4e   : > { %p7601_p2 = pnand %p7600_p0, %p7599_p12  ;;  %p7607_p3 = scmp.lt.u32.totalorder %s7598_s16, %s7944_s28 }
  0x4f   : > { %p7606_p10 = por %p7605_p6, %p7604_p13 }
  0x50   : > { %p7602_p1 = pneg %p7601_p2 }
  0x51   : > { %p7608_p5 = por %p7607_p3, %p7606_p10 }
  0x53   : > { %p7609_p9 = pnand %p7608_p5, %p7602_p1 }
  0x55   : > { %7612 = shalt.err (!%p7609_p9)
}
  0x56   : > { %s7613_s29 = scalar_lea.vmem %s7946_s14, 2752  ;;  %s7766_s9 = smov [#allocation3]  }
  0x57   : > { %p7614_p12 = scmp.ne.s32.totalorder %s7946_s14, %s7613_s29  ;;  %s7618_s13 = sshll.u32 %s7766_s9, 4  ;;  %s7619_s13 = int_to_ptr.vmem [resolvable:$false] %s7618_s13 }
  0x58   : > { %s7620_s27 = scalar_lea.vmem %s7619_s13, 5504  ;;  %p7621_p4 = scmp.lt.s32.totalorder %s7946_s14, %s7619_s13 }
  0x59   : > { %p7616_p2 = pnand %p7614_p12, %p7600_p0  ;;  %p7622_p13 = scmp.lt.s32.totalorder %s7620_s27, %s7613_s29 }
  0x5b   : > { %p7617_p7 = pneg %p7616_p2  ;;  %p7623_p6 = por %p7622_p13, %p7621_p4 }
  0x5d   : > { %p7624_p10 = pnand %p7623_p6, %p7617_p7 }
  0x5f   : > { %7627 = shalt.err (!%p7624_p10)
}
  0x60   : > { %s7767_s16 = smov 64   ;;  %s7768_s30 = smov 4  }
  0x61   : > { %7309 = dma.hbm_to_vmem [thread:$0]  (!%p7937_p11), %s7944_s28, 2752, %s7946_s14, %s7948_s15, %s7767_s16, %s7767_s16, %s7768_s30  }
  0x62   : > { %239 = sbr.rel (%p7847_p8) target bundleno = 726 (0x2d6), region = 32  ;;  %s7979_s6 = sand.u32 (!%p7847_p8), 1, %s7750_s19  }
  0x63   : > { %s7280_s11 = smul.u32 (!%p7847_p8), 172, %s7979_s6  ;;  %s242_s12 = scalar_lea.sflag (!%p7847_p8), [#allocation4], %s7979_s6 }
  0x64   : > { %p8822_p4 = scmp.ne.s32.totalorder (!%p7847_p8), %s8815_s24, 0 }
  0x65   : > { %s7983_s29 = scalar_lea.vmem (!%p7847_p8), [#allocation3], %s7280_s11 }
  0x69   : > { %7729 = dma.done.wait (%p8822_p4), %s242_s12, 2752  }
  0x6a   : > { %7731 = vsyncadd (%p8822_p4), %s242_s12, 4294964544  ;;  %p8823_p7 = scmp.eq.s32.totalorder %s7826_s22, 0 }
  0x6c   : > { %7733 = dma.done.wait (%p8823_p7), [#allocation7], 4896   ;;  %p8824_p8 = pmov %p8823_p7 }
  0x6d   : > { %vm507_vm0 = vcmask 1041408   ;;  %vm452_vm1 = vcmask 31744   ;;  %v361_v0 = vld [vmem:[#allocation6] sm:$0x3]  ;;  %v7371_v2 = vld [vmem:[%s7983_s29] sm:$0xff]   ;;  %v7374_v6 = vld [vmem:[%s7983_s29 + $0x10] sm:$0xff]  }
  0x6e   : > { %7735 = vsyncadd (%p8824_p8), [#allocation7], 4294962400  ;;  %7268 = vmatprep.subr.msk.bf16.mxu1 %vm507_vm0, %v361_v0  ;;  %v509_v1 = vsel %vm507_vm0, %v361_v0, 0  ;;  %vm2502_vm2 = vsmask.f32 6400  ;;  %v7372_v3 = vld [vmem:[%s7983_s29 + $0x8] sm:$0xff]   ;;  %6638 = vmatprep.mubr.msk.bf16.mxu1 %vm452_vm1, %v7371_v2 }
  0x6f   : > { %6637 = vmatpush3.bf16.msra.mxu1 %v509_v1  ;;  %v2408_v4 = vld [vmem:[#allocation6 + $0x8] sm:$0x3]  ;;  %v7373_v7 = vld [vmem:[%s7983_s29 + $0x8] sm:$0xfe]   ;;  %v3053_v8 = vld [vmem:[#allocation6 + $0xa] sm:$0x3] }
  0x70   : > { %7272 = vmatprep.subr.msk.bf16.mxu0 %vm507_vm0, %v2408_v4  ;;  %v8000_v5 = vsel %vm507_vm0, %v2408_v4, 0  ;;  %v2512_v9 = vshrl.u32 %v7374_v6, 16  ;;  %v2515_v10 = vshll.u32 %v7374_v6, 16  ;;  %v2504_v11 = vshrl.u32 %v7373_v7, 16  ;;  %v7375_v13 = vld [vmem:[%s7983_s29 + $0x18] sm:$0xff]   ;;  %v7376_v16 = vld [vmem:[%s7983_s29 + $0x10] sm:$0xff]  }
  0x71   : > { %6789 = vmatpush3.bf16.msra.mxu0 %v8000_v5  ;;  %v2507_v12 = vshll.u32 %v7373_v7, 16  ;;  %v7377_v17 = vld [vmem:[%s7983_s29 + $0x18] sm:$0xff]   ;;  %v2521_v20 = vshrl.u32 %v7375_v13, 16  ;;  %v2524_v21 = vshll.u32 %v7375_v13, 16  ;;  %v7378_v27 = vld [vmem:[%s7983_s29 + $0x20] sm:$0xff]   ;;  %v7379_v29 = vld [vmem:[%s7983_s29 + $0x28] sm:$0xff]  }
  0x72   : > { %6639 = vmatmul.mubr.msk.bf16.vlgmr.msra.gmra.mrb[0].mxu1 %vm452_vm1, %v7372_v3  ;;  %7274 = vmatprep.subr.msk.bf16.mxu0 %vm507_vm0, %v3053_v8  ;;  %v2514_v14 = vrot.slane %v2512_v9, 1  ;;  %v2517_v15 = vrot.slane %v2515_v10, 2  ;;  %v2506_v18 = vrot.slane %v2504_v11, 1  ;;  %v762_v23 = vld [vmem:[#allocation6 + $0x2] sm:$0x3]  ;;  %v2530_v32 = vshrl.u32 %v7378_v27, 16 }
  0x73   : > { %v2509_v19 = vrot.slane %v2507_v12, 2  ;;  %6642 = vmatprep.mubr.msk.bf16.mxu1 %vm452_vm1, %v7376_v16  ;;  %v2523_v25 = vrot.slane %v2521_v20, 1  ;;  %v2526_v26 = vrot.slane %v2524_v21, 2  ;;  %7269 = vmatprep.subr.msk.bf16.mxu1 %vm507_vm0, %v762_v23  ;;  %v1060_v28 = vsel %vm507_vm0, %v762_v23, 0  ;;  %v7380_v37 = vld [vmem:[%s7983_s29 + $0x20] sm:$0xff]   ;;  %v7382_v43 = vld [vmem:[%s7983_s29 + $0x30] sm:$0xff]  }
  0x74   : > { %v2518_v22 = vor.u32 %v2517_v15, %v2514_v14  ;;  %6675 = vmatpush3.bf16.msra.mxu1 %v1060_v28  ;;  %v2533_v33 = vshll.u32 %v7378_v27, 16  ;;  %v3240_v34 = vsel %vm507_vm0, %v3053_v8, 0  ;;  %v2539_v35 = vshrl.u32 %v7379_v29, 16  ;;  %v7383_v44 = vld [vmem:[%s7983_s29 + $0x38] sm:$0xff]   ;;  %v7381_v47 = vld [vmem:[%s7983_s29 + $0x28] sm:$0xff]   ;;  %v7384_v53 = vld [vmem:[%s7983_s29 + $0x30] sm:$0xff]  }
  0x75   : > { %v2510_v24 = vor.u32 %v2509_v19, %v2506_v18  ;;  %v2527_v31 = vor.u32 %v2526_v26, %v2523_v25  ;;  %v2542_v36 = vshll.u32 %v7379_v29, 16  ;;  %v2532_v39 = vrot.slane %v2530_v32, 1  ;;  %v7386_v57 = vld [vmem:[%s7983_s29 + $0x40] sm:$0xff]   ;;  %v7387_v60 = vld [vmem:[%s7983_s29 + $0x48] sm:$0xff]   ;;  %v7385_v2 = vld [vmem:[%s7983_s29 + $0x38] sm:$0xff]   ;;  %s7281_s24 = smul.u32 144, %s7979_s6 }
  0x76   : > { %v2535_v40 = vrot.slane %v2533_v33, 2  ;;  %v2541_v41 = vrot.slane %v2539_v35, 1  ;;  %v2548_v48 = vshrl.u32 %v7382_v43, 16  ;;  %v2551_v49 = vshll.u32 %v7382_v43, 16  ;;  %v7388_v8 = vld [vmem:[%s7983_s29 + $0x40] sm:$0xff]   ;;  %v7390_v10 = vld [vmem:[%s7983_s29 + $0x50] sm:$0xff]  }
  0x77   : > { %v2519_v30 = vsel %vm2502_vm2, %v2510_v24, %v2518_v22  ;;  %v2528_v38 = vsel %vm2502_vm2, %v2518_v22, %v2527_v31  ;;  %v2544_v42 = vrot.slane %v2542_v36, 2  ;;  %v2557_v50 = vshrl.u32 %v7383_v44, 16  ;;  %v7391_v11 = vld [vmem:[%s7983_s29 + $0x58] sm:$0xff]   ;;  %v7389_v24 = vld [vmem:[%s7983_s29 + $0x48] sm:$0xff]   ;;  %v7392_v26 = vld [vmem:[%s7983_s29 + $0x50] sm:$0xff]   ;;  %s8567_s26 = scalar_lea.vmem [#allocation9], %s7281_s24 }
  0x78   : > { %6790 = vmatprep.mubr.msk.bf16.mxu0 %vm452_vm1, %v2519_v30  ;;  %v2536_v45 = vor.u32 %v2535_v40, %v2532_v39  ;;  %v2560_v52 = vshll.u32 %v7383_v44, 16  ;;  %v2550_v54 = vrot.slane %v2548_v48, 1  ;;  %v2553_v55 = vrot.slane %v2551_v49, 2  ;;  %v3565_v22 = vld [vmem:[#allocation6 + $0xc] sm:$0x3]  ;;  %v7395_v32 = vld [vmem:[%s7983_s29 + $0x10] sm:$0xff]  }
  0x79   : > { %6791 = vmatmul.mubr.msk.bf16.vlgmr.msra.gmra.mrb[0].mxu0 %vm452_vm1, %v2528_v38  ;;  %v2545_v46 = vor.u32 %v2544_v42, %v2541_v41  ;;  %v2559_v56 = vrot.slane %v2557_v50, 1  ;;  %v2566_v62 = vshrl.u32 %v7386_v57, 16  ;;  %v2569_v63 = vshll.u32 %v7386_v57, 16  ;;  %v7394_v30 = vld [vmem:[%s7983_s29 + $0x8] sm:$0xfc]   ;;  %v7396_v39 = vld [vmem:[%s7983_s29 + $0x18] sm:$0xff]  }
  0x7a   : > { %6643 = vmatmul.mubr.msk.bf16.gmra.mrb[4].mxu1 %vm452_vm1, %v7377_v17  ;;  %6827 = vmatpush3.bf16.msra.mxu0 %v3240_v34  ;;  %v2537_v51 = vsel %vm2502_vm2, %v2527_v31, %v2536_v45  ;;  %v2562_v59 = vrot.slane %v2560_v52, 2  ;;  %v2554_v61 = vor.u32 %v2553_v55, %v2550_v54  ;;  %v2575_v0 = vshrl.u32 %v7387_v60, 16  ;;  %v7393_v34 = vld [vmem:[%s7983_s29 + $0x58] sm:$0xff]   ;;  %v7399_v41 = vld [vmem:[%s7983_s29 + $0x20] sm:$0xff]   ;;  %v7398_v43 = vld [vmem:[%s7983_s29 + $0x68] sm:$0xff]   ;;  %s7282_s10 = smul.u32 2304, %s7826_s22 }
  0x7b   : > { %6646 = vmatprep.mubr.msk.bf16.mxu1 %vm452_vm1, %v7380_v37  ;;  %6794 = vmatprep.mubr.msk.bf16.mxu0 %vm452_vm1, %v2537_v51  ;;  %v2546_v58 = vsel %vm2502_vm2, %v2536_v45, %v2545_v46  ;;  %v2568_v3 = vrot.slane %v2566_v62, 1  ;;  %v2571_v4 = vrot.slane %v2569_v63, 2  ;;  %v2578_v7 = vshll.u32 %v7387_v60, 16  ;;  %v7397_v37 = vld [vmem:[%s7983_s29 + $0x60] sm:$0xff]   ;;  %v7401_v45 = vld [vmem:[%s7983_s29 + $0x70] sm:$0xff]   ;;  %v7400_v49 = vld [vmem:[%s7983_s29 + $0x28] sm:$0xff]  }
  0x7c   : > { %v2555_v1 = vsel %vm2502_vm2, %v2545_v46, %v2554_v61  ;;  %v2563_v6 = vor.u32 %v2562_v59, %v2559_v56  ;;  %v2584_v12 = vshrl.u32 %v7390_v10, 16  ;;  %v2587_v13 = vshll.u32 %v7390_v10, 16  ;;  %7275 = vmatprep.subr.msk.bf16.mxu0 %vm507_vm0, %v3565_v22  ;;  %v7409_v46 = vld [vmem:[%s7983_s29] sm:$0xff]   ;;  %v7403_v50 = vld [vmem:[%s7983_s29 + $0x30] sm:$0xff]   ;;  %v7402_v56 = vld [vmem:[%s7983_s29 + $0x78] sm:$0xff]   ;;  %s5769_s28 = sshll.u32 %s8567_s26, 4  ;;  %s8690_s9 = scalar_lea.hbm %s8809_s3, %s7282_s10  ;;  %s8685_s28 = int_to_ptr.vmem [resolvable:$true] %s5769_s28 }
  0x7d   : > { %v2572_v9 = vor.u32 %v2571_v4, %v2568_v3  ;;  %v2577_v15 = vrot.slane %v2575_v0, 1  ;;  %v2580_v16 = vrot.slane %v2578_v7, 2  ;;  %v2593_v20 = vshrl.u32 %v7391_v11, 16  ;;  %v1385_v52 = vld [vmem:[#allocation6 + $0x4] sm:$0x3]  ;;  %s5748_s13 = scalar_lea.sflag [#allocation5], %s7979_s6 }
  0x7e   : > { %v2564_v14 = vsel %vm2502_vm2, %v2554_v61, %v2563_v6  ;;  %v2586_v18 = vrot.slane %v2584_v12, 1  ;;  %v2589_v19 = vrot.slane %v2587_v13, 2  ;;  %v2596_v21 = vshll.u32 %v7391_v11, 16  ;;  %7270 = vmatprep.subr.msk.bf16.mxu1 %vm507_vm0, %v1385_v52  ;;  %v7404_v63 = vld [vmem:[%s7983_s29 + $0x38] sm:$0xff]   ;;  %s7628_s27 = scalar_lea.vmem %s8685_s28, 2304  ;;  %p8825_p0 = scmp.ne.s32.totalorder %s8820_s8, 0 }
  0x7f   : > { %v2573_v17 = vsel %vm2502_vm2, %v2563_v6, %v2572_v9  ;;  %v2581_v23 = vor.u32 %v2580_v16, %v2577_v15  ;;  %v2595_v27 = vrot.slane %v2593_v20, 1  ;;  %v3148_v35 = vrot.slane %v7394_v30, 2  ;;  %v7414_v6 = vld [vmem:[%s7983_s29 + $0x18] sm:$0xff]   ;;  %v7408_v16 = vld [vmem:[%s7983_s29 + $0x48] sm:$0xff]   ;;  %v7415_v20 = vld [vmem:[%s7983_s29 + $0x20] sm:$0xff]   ;;  %p7629_p11 = scmp.ne.s32.totalorder %s8685_s28, %s7628_s27  ;;  %s7770_s16 = smov [#allocation9]  }
  0x80   : > { %v2590_v25 = vor.u32 %v2589_v19, %v2586_v18  ;;  %v2598_v28 = vrot.slane %v2596_v21, 2  ;;  %v3149_v36 = vrot.slane %v7395_v32, 2  ;;  %vm3147_vm3 = vcmask 1045504   ;;  %v7412_v19 = vld [vmem:[%s7983_s29 + $0x50] sm:$0xff]   ;;  %v8112_v32 = vld [vmem:[#allocation6 + $0xe] sm:$0x3] }
  0x81   : > { %6795 = vmatmul.mubr.msk.bf16.gmra.mrb[4].mxu0 %vm452_vm1, %v2546_v58  ;;  %v2582_v29 = vsel %vm2502_vm2, %v2572_v9, %v2581_v23  ;;  %v3151_v42 = vrot.slane %v7396_v39, 2  ;;  %v3153_v44 = vrot.slane %v7399_v41, 2  ;;  %v3751_v48 = vsel %vm507_vm0, %v3565_v22, 0  ;;  %v7405_v58 = vld [vmem:[%s7983_s29 + $0x80] sm:$0xff]   ;;  %v7419_v41 = vld [vmem:[%s7983_s29 + $0x30] sm:$0xff]   ;;  %p7630_p1 = pnand %p7629_p11, %p8825_p0  ;;  %s7632_s30 = sshll.u32 %s7770_s16, 4  ;;  %s7633_s30 = int_to_ptr.vmem [resolvable:$false] %s7632_s30 }
  0x82   : > { %6647 = vmatmul.mubr.msk.bf16.gmra.mrb[8].mxu1 %vm452_vm1, %v7381_v47  ;;  %6798 = vmatprep.mubr.msk.bf16.mxu0 %vm452_vm1, %v2555_v1  ;;  %v2591_v31 = vsel %vm2502_vm2, %v2581_v23, %v2590_v25  ;;  %v8058_v33 = vor.u32 %v2598_v28, %v2595_v27  ;;  %v3150_v40 = vsel %vm3147_vm3, %v3148_v35, %v3149_v36  ;;  %v860_v54 = vshll.u32 %v7409_v46, 16  ;;  %v7407_v1 = vld [vmem:[%s7983_s29 + $0x40] sm:$0xff]   ;;  %s7634_s11 = scalar_lea.vmem %s7633_s30, 4608  ;;  %p7635_p5 = scmp.lt.s32.totalorder %s8685_s28, %s7633_s30 }
  0x83   : > { %6650 = vmatprep.mubr.msk.bf16.mxu1 %vm452_vm1, %v7384_v53  ;;  %v3152_v47 = vsel %vm3147_vm3, %v3149_v36, %v3151_v42  ;;  %v3154_v51 = vsel %vm3147_vm3, %v3151_v42, %v3153_v44  ;;  %v7410_v53 = vld [vmem:[%s7983_s29 + $0x8] sm:$0xff]   ;;  %v3155_v55 = vrot.slane %v7400_v49, 2  ;;  %v3157_v57 = vrot.slane %v7403_v50, 2  ;;  %p7631_p3 = pneg %p7630_p1  ;;  %p7636_p9 = scmp.lt.s32.totalorder %s7634_s11, %s7628_s27 }
  0x84   : > { %v2600_v38 = vsel %vm2502_vm2, %v2590_v25, %v8058_v33  ;;  %v858_v59 = vshrl.u32 %v7409_v46, 16  ;;  %v862_v60 = vrot.slane %v860_v54, 1  ;;  %v865_v61 = vshll.u32 %v7410_v53, 16 }
  0x85   : > { %v3156_v62 = vsel %vm3147_vm3, %v3153_v44, %v3155_v55  ;;  %v3158_v0 = vsel %vm3147_vm3, %v3155_v55, %v3157_v57  ;;  %v3159_v7 = vrot.slane %v7404_v63, 2  ;;  %vm856_vm4 = vsmask.f32 7424  ;;  %v7417_v55 = vld [vmem:[%s7983_s29 + $0x68] sm:$0xff]   ;;  %p7637_p12 = por %p7636_p9, %p7635_p5 }
  0x86   : > { %v863_v3 = vor.u32 %v862_v60, %v858_v59  ;;  %v867_v4 = vrot.slane %v865_v61, 1  ;;  %v3161_v9 = vrot.slane %v7407_v1, 2  ;;  %v869_v11 = vshrl.u32 %v7410_v53, 16  ;;  %v7423_v59 = vld [vmem:[%s7983_s29 + $0x40] sm:$0xff]   ;;  %v7426_v63 = vld [vmem:[%s7983_s29 + $0x48] sm:$0xff]  }
  0x87   : > { %v3160_v15 = vsel %vm3147_vm3, %v3157_v57, %v3159_v7  ;;  %v3163_v25 = vrot.slane %v7408_v16, 2  ;;  %v889_v27 = vshll.u32 %v7415_v20, 16  ;;  %v885_v30 = vshrl.u32 %v7414_v6, 16  ;;  %p7638_p2 = pnand %p7637_p12, %p7631_p3 }
  0x88   : > { %v868_v12 = vsel %vm856_vm4, %v863_v3, %v867_v4  ;;  %v871_v21 = vor.u32 %v869_v11, %v867_v4  ;;  %v893_v35 = vshrl.u32 %v7415_v20, 16  ;;  %v7424_v11 = vld [vmem:[%s7983_s29 + $0x80] sm:$0xff]   ;;  %vm1479_vm5 = vcmask 1046528  }
  0x89   : > { %6799 = vmatmul.mubr.msk.bf16.gmra.mrb[8].mxu0 %vm452_vm1, %v2564_v14  ;;  %v881_v14 = vshll.u32 %v7414_v6, 16  ;;  %v3177_v20 = vrot.slane %v7424_v11, 2  ;;  %vm4170_vm6 = vsmask.f32 5376  ;;  %vm4815_vm7 = vcmask 1044480  }
  0x8a   : > { %6651 = vmatmul.mubr.msk.bf16.gmra.mrb[12].mxu1 %vm452_vm1, %v7385_v2  ;;  %6802 = vmatprep.mubr.msk.bf16.mxu0 %vm452_vm1, %v2573_v17  ;;  %v7411_v2 = vld [vmem:[%s7983_s29 + $0x10] sm:$0xff]   ;;  %v3162_v17 = vsel %vm3147_vm3, %v3159_v7, %v3161_v9  ;;  %v925_v7 = vshrl.u32 %v7423_v59, 16 }
  0x8b   : > { %6654 = vmatprep.mubr.msk.bf16.mxu1 %vm452_vm1, %v7388_v8  ;;  %v7406_v8 = vld [vmem:[%s7983_s29 + $0x88] sm:$0xff]   ;;  %v873_v10 = vshll.u32 %v7411_v2, 16  ;;  %v877_v13 = vshrl.u32 %v7411_v2, 16  ;;  %v883_v23 = vrot.slane %v881_v14, 1  ;;  %v921_v2 = vshll.u32 %v7423_v59, 16  ;;  %v7427_v14 = vld [vmem:[%s7983_s29 + $0x50] sm:$0xff]  }
  0x8d   : > { %v875_v18 = vrot.slane %v873_v10, 1  ;;  %v887_v42 = vor.u32 %v885_v30, %v883_v23  ;;  %v7421_v10 = vld [vmem:[%s7983_s29 + $0x78] sm:$0xff]   ;;  %v7428_v30 = vld [vmem:[%s7983_s29 + $0x90] sm:$0xff]  }
  0x8f   : > { %v879_v22 = vor.u32 %v877_v13, %v875_v18  ;;  %v876_v28 = vsel %vm856_vm4, %v871_v21, %v875_v18  ;;  %v923_v13 = vrot.slane %v921_v2, 1  ;;  %v7430_v18 = vld [vmem:[%s7983_s29 + $0x58] sm:$0xff]   ;;  %v937_v21 = vshll.u32 %v7427_v14, 16 }
  0x91   : > { %6803 = vmatmul.mubr.msk.bf16.gmra.mrb[12].mxu0 %vm452_vm1, %v2582_v29  ;;  %v7413_v29 = vld [vmem:[%s7983_s29 + $0x58] sm:$0xff]   ;;  %v927_v16 = vor.u32 %v925_v7, %v923_v13 }
  0x92   : > { %6655 = vmatmul.mubr.msk.bf16.gmra.mrb[16].mxu1 %vm452_vm1, %v7389_v24  ;;  %6806 = vmatprep.mubr.msk.bf16.mxu0 %vm452_vm1, %v2591_v31  ;;  %v7418_v24 = vld [vmem:[%s7983_s29 + $0x28] sm:$0xff]   ;;  %v1572_v31 = vsel %vm507_vm0, %v1385_v52, 0  ;;  %v3167_v46 = vrot.slane %v7413_v29, 2  ;;  %v909_v52 = vshrl.u32 %v7419_v41, 16 }
  0x93   : > { %6658 = vmatprep.mubr.msk.bf16.mxu1 %vm452_vm1, %v7392_v26  ;;  %v3165_v26 = vrot.slane %v7412_v19, 2  ;;  %v897_v36 = vshll.u32 %v7418_v24, 16  ;;  %v901_v50 = vshrl.u32 %v7418_v24, 16  ;;  %v3175_v19 = vrot.slane %v7421_v10, 2  ;;  %v7425_v24 = vld [vmem:[%s7983_s29 + $0x88] sm:$0xff]   ;;  %v7440_v10 = vld [vmem:[%s7983_s29 + $0x80] sm:$0xff]  }
  0x95   : > { %v3166_v39 = vsel %vm3147_vm3, %v3163_v25, %v3165_v26  ;;  %v899_v44 = vrot.slane %v897_v36, 1  ;;  %v3168_v54 = vsel %vm3147_vm3, %v3165_v26, %v3167_v46 }
  0x97   : > { %v903_v60 = vor.u32 %v901_v50, %v899_v44 }
  0x99   : > { %6807 = vmatmul.mubr.msk.bf16.gmra.mrb[16].mxu0 %vm452_vm1, %v2600_v38  ;;  %v7416_v38 = vld [vmem:[%s7983_s29 + $0x60] sm:$0xff]  }
  0x9a   : > { %6659 = vmatmul.mubr.msk.bf16.gmra.mrb[20].mxu1 %vm452_vm1, %v7393_v34  ;;  %6828 = vmatprep.mubr.msk.bf16.mxu0 %vm452_vm1, %v3150_v40  ;;  %v884_v34 = vsel %vm856_vm4, %v879_v22, %v883_v23  ;;  %v891_v40 = vrot.slane %v889_v27, 1  ;;  %v8150_v22 = vld [vmem:[#allocation6 + $0x6] sm:$0x3]  ;;  %v941_v27 = vshrl.u32 %v7427_v14, 16  ;;  %v7443_v14 = vld [vmem:[%s7983_s29 + $0x88] sm:$0xff]  }
  0x9b   : > { %6662 = vmatprep.mubr.msk.bf16.mxu1 %vm452_vm1, %v7397_v37  ;;  %v3164_v37 = vsel %vm3147_vm3, %v3161_v9, %v3163_v25  ;;  %v933_v25 = vshrl.u32 %v7426_v63, 16 }
  0x9c   : > { %v892_v49 = vsel %vm856_vm4, %v887_v42, %v891_v40 }
  0xa1   : > { %6829 = vmatmul.mubr.msk.bf16.vlgmr.msra.gmra.mrb[0].mxu0 %vm452_vm1, %v3152_v47  ;;  %v3169_v47 = vrot.slane %v7416_v38, 2 }
  0xa2   : > { %6663 = vmatmul.mubr.msk.bf16.gmra.mrb[24].mxu1 %vm452_vm1, %v7398_v43  ;;  %6865 = vmatpush3.bf16.msra.mxu0 %v3751_v48  ;;  %v895_v43 = vor.u32 %v893_v35, %v891_v40  ;;  %v905_v48 = vshll.u32 %v7419_v41, 16  ;;  %v7431_v35 = vld [vmem:[%s7983_s29 + $0x60] sm:$0xff]   ;;  %v3179_v40 = vrot.slane %v7425_v24, 2  ;;  %v3181_v41 = vrot.slane %v7428_v30, 2 }
  0xa3   : > { %6666 = vmatprep.mubr.msk.bf16.mxu1 %vm452_vm1, %v7401_v45  ;;  %6832 = vmatprep.mubr.msk.bf16.mxu0 %vm452_vm1, %v3154_v51  ;;  %v7422_v45 = vld [vmem:[%s7983_s29 + $0x38] sm:$0xff]   ;;  %v3170_v57 = vsel %vm3147_vm3, %v3167_v46, %v3169_v47  ;;  %v953_v42 = vshll.u32 %v7431_v35, 16  ;;  %v993_v24 = vshll.u32 %v7443_v14, 16  ;;  %v7444_v30 = vld [vmem:[%s7983_s29 + $0x90] ss:$0 sps:$4 sm:$0x11]  }
  0xa4   : > { %7276 = vmatprep.subr.msk.bf16.mxu0 %vm507_vm0, %v8112_v32  ;;  %v900_v51 = vsel %vm856_vm4, %v895_v43, %v899_v44  ;;  %v913_v53 = vshll.u32 %v7422_v45, 16  ;;  %v917_v4 = vshrl.u32 %v7422_v45, 16  ;;  %v7429_v44 = vld [vmem:[%s7983_s29 + $0x98] ss:$0 sps:$4 sm:$0x33]   ;;  %v949_v45 = vshrl.u32 %v7430_v18, 16 }
  0xa5   : > { %v7433_v46 = vld [vmem:[%s7983_s29 + $0x18] sm:$0xff]   ;;  %v3180_v50 = vsel %vm3147_vm3, %v3177_v20, %v3179_v40  ;;  %v3183_v59 = vrot.slane %v7429_v44, 2 }
  0xa9   : > { %6833 = vmatmul.mubr.msk.bf16.gmra.mrb[4].mxu0 %vm452_vm1, %v3156_v62  ;;  %v915_v62 = vrot.slane %v913_v53, 1  ;;  %v955_v53 = vrot.slane %v953_v42, 1  ;;  %v7447_v42 = vld [vmem:[%s7983_s29] sm:$0xfe]  }
  0xaa   : > { %6667 = vmatmul.mubr.msk.bf16.gmra.mrb[28].mxu1 %vm452_vm1, %v7402_v56  ;;  %6836 = vmatprep.mubr.msk.bf16.mxu0 %vm452_vm1, %v3158_v0  ;;  %v7420_v56 = vld [vmem:[%s7983_s29 + $0x70] sm:$0xff]   ;;  %v3171_v0 = vrot.slane %v7417_v55, 2 }
  0xab   : > { %6670 = vmatprep.mubr.msk.bf16.mxu1 %vm452_vm1, %v7405_v58  ;;  %v907_v58 = vrot.slane %v905_v48, 1  ;;  %v3173_v1 = vrot.slane %v7420_v56, 2  ;;  %v957_v48 = vshrl.u32 %v7431_v35, 16 }
  0xac   : > { %v3172_v9 = vsel %vm3147_vm3, %v3169_v47, %v3171_v0 }
  0xad   : > { %v911_v61 = vor.u32 %v909_v52, %v907_v58  ;;  %v908_v3 = vsel %vm856_vm4, %v903_v60, %v907_v58  ;;  %v3176_v29 = vsel %vm3147_vm3, %v3173_v1, %v3175_v19  ;;  %v3182_v52 = vsel %vm3147_vm3, %v3179_v40, %v3181_v41  ;;  %v7439_v58 = vld [vmem:[%s7983_s29 + $0x78] sm:$0xff]  }
  0xae   : > { %v959_v56 = vor.u32 %v957_v48, %v955_v53  ;;  %v3660_v60 = vrot.slane %v7433_v46, 2  ;;  %v1001_v40 = vshll.u32 %v7444_v30, 16  ;;  %v7461_v30 = vld [vmem:[%s7983_s29 + $0x40] sm:$0xff]  }
  0xaf   : > { %v916_v6 = vsel %vm856_vm4, %v911_v61, %v915_v62 }
  0xb1   : > { %6837 = vmatmul.mubr.msk.bf16.gmra.mrb[8].mxu0 %vm452_vm1, %v3160_v15  ;;  %v919_v15 = vor.u32 %v917_v4, %v915_v62  ;;  %v3184_v4 = vsel %vm3147_vm3, %v3181_v41, %v3183_v59  ;;  %v7446_v59 = vld [vmem:[%s7983_s29 + $0x50] sm:$0xff]  }
  0xb2   : > { %6671 = vmatmul.mubr.msk.bf16.gmra.mrb[32].mxu1 %vm452_vm1, %v7406_v8  ;;  %6840 = vmatprep.mubr.msk.bf16.mxu0 %vm452_vm1, %v3162_v17  ;;  %v929_v8 = vshll.u32 %v7426_v63, 16 }
  0xb3   : > { %6676 = vmatprep.mubr.msk.bf16.mxu1 %vm452_vm1, %v868_v12  ;;  %v3174_v12 = vsel %vm3147_vm3, %v3171_v0, %v3173_v1  ;;  %v924_v23 = vsel %vm856_vm4, %v919_v15, %v923_v13 }
  0xb4   : > { %v931_v17 = vrot.slane %v929_v8, 1 }
  0xb6   : > { %v932_v26 = vsel %vm856_vm4, %v927_v16, %v931_v17  ;;  %v935_v36 = vor.u32 %v933_v25, %v931_v17  ;;  %v985_v17 = vshll.u32 %v7440_v10, 16 }
  0xb9   : > { %6841 = vmatmul.mubr.msk.bf16.gmra.mrb[12].mxu0 %vm452_vm1, %v3164_v37 }
  0xba   : > { %6677 = vmatmul.mubr.msk.bf16.vlgmr.msra.gmra.mrb[0].mxu1 %vm452_vm1, %v876_v28  ;;  %6844 = vmatprep.mubr.msk.bf16.mxu0 %vm452_vm1, %v3166_v39  ;;  %v945_v28 = vshll.u32 %v7430_v18, 16  ;;  %v7435_v39 = vld [vmem:[%s7983_s29 + $0x68] sm:$0xff]  }
  0xbb   : > { %6680 = vmatprep.mubr.msk.bf16.mxu1 %vm452_vm1, %v884_v34  ;;  %6713 = vmatpush3.bf16.msra.mxu1 %v1572_v31  ;;  %v3178_v31 = vsel %vm3147_vm3, %v3175_v19, %v3177_v20  ;;  %v939_v34 = vrot.slane %v937_v21, 1  ;;  %v965_v0 = vshrl.u32 %v7435_v39, 16  ;;  %v7438_v19 = vld [vmem:[%s7983_s29 + $0x30] sm:$0xff]   ;;  %v981_v20 = vshrl.u32 %v7439_v58, 16 }
  0xbc   : > { %7271 = vmatprep.subr.msk.bf16.mxu1 %vm507_vm0, %v8150_v22  ;;  %v947_v38 = vrot.slane %v945_v28, 1 }
  0xbd   : > { %v943_v37 = vor.u32 %v941_v27, %v939_v34  ;;  %v940_v43 = vsel %vm856_vm4, %v935_v36, %v939_v34  ;;  %v7441_v27 = vld [vmem:[%s7983_s29 + $0x38] sm:$0xff]   ;;  %v995_v36 = vrot.slane %v993_v24, 1 }
  0xbe   : > { %v951_v55 = vor.u32 %v949_v45, %v947_v38  ;;  %v8202_v34 = vld [vmem:[#allocation6 + $0x10] sm:$0x3]  ;;  %v7442_v45 = vld [vmem:[%s7983_s29 + $0x40] sm:$0xff]  }
  0xbf   : > { %v948_v47 = vsel %vm856_vm4, %v943_v37, %v947_v38  ;;  %v3668_v37 = vrot.slane %v7441_v27, 2  ;;  %v7458_v24 = vld [vmem:[%s7983_s29 + $0x78] sm:$0xff]  }
  0xc0   : > { %v956_v63 = vsel %vm856_vm4, %v951_v55, %v955_v53  ;;  %v7449_v55 = vld [vmem:[%s7983_s29 + $0x10] sm:$0xff]  }
  0xc1   : > { %6845 = vmatmul.mubr.msk.bf16.gmra.mrb[16].mxu0 %vm452_vm1, %v3168_v54  ;;  %v7436_v54 = vld [vmem:[%s7983_s29 + $0x70] sm:$0xff]  }
  0xc2   : > { %6681 = vmatmul.mubr.msk.bf16.gmra.mrb[4].mxu1 %vm452_vm1, %v892_v49  ;;  %6848 = vmatprep.mubr.msk.bf16.mxu0 %vm452_vm1, %v3170_v57  ;;  %v961_v49 = vshll.u32 %v7435_v39, 16  ;;  %v969_v62 = vshll.u32 %v7436_v54, 16  ;;  %v973_v2 = vshrl.u32 %v7436_v54, 16  ;;  %v997_v39 = vshrl.u32 %v7443_v14, 16 }
  0xc3   : > { %6684 = vmatprep.mubr.msk.bf16.mxu1 %vm452_vm1, %v900_v51  ;;  %v7432_v51 = vld [vmem:[%s7983_s29 + $0x10] sm:$0xfc]  }
  0xc4   : > { %v963_v57 = vrot.slane %v961_v49, 1  ;;  %v3659_v61 = vrot.slane %v7432_v51, 2  ;;  %v971_v8 = vrot.slane %v969_v62, 1  ;;  %v999_v48 = vor.u32 %v997_v39, %v995_v36 }
  0xc5   : > { %v1003_v49 = vrot.slane %v1001_v40, 1  ;;  %v1483_v62 = vrot.slane %v7449_v55, 1  ;;  %v1495_v39 = vrot.slane %v7461_v30, 1 }
  0xc6   : > { %v964_v1 = vsel %vm856_vm4, %v959_v56, %v963_v57  ;;  %v3661_v7 = vsel %vm3147_vm3, %v3659_v61, %v3660_v60  ;;  %v967_v11 = vor.u32 %v965_v0, %v963_v57  ;;  %v7452_v57 = vld [vmem:[%s7983_s29 + $0x18] sm:$0xff]   ;;  %v3674_v0 = vrot.slane %v7446_v59, 2 }
  0xc7   : > { %v1004_v54 = vsel %vm856_vm4, %v999_v48, %v1003_v49  ;;  %v8276_v48 = vld [vmem:[%s7983_s29 + $0x98] sm:$0xff]  }
  0xc8   : > { %v972_v18 = vsel %vm856_vm4, %v967_v11, %v971_v8  ;;  %v7454_v11 = vld [vmem:[%s7983_s29 + $0x68] sm:$0xff]   ;;  %v7468_v49 = vld [vmem:[%s7983_s29 + $0x58] sm:$0xff]  }
  0xc9   : > { %6849 = vmatmul.mubr.msk.bf16.gmra.mrb[20].mxu0 %vm452_vm1, %v3172_v9  ;;  %v7437_v9 = vld [vmem:[%s7983_s29 + $0x28] sm:$0xff]   ;;  %v1501_v55 = vrot.slane %v7468_v49, 1 }
  0xca   : > { %6685 = vmatmul.mubr.msk.bf16.gmra.mrb[8].mxu1 %vm452_vm1, %v908_v3  ;;  %6852 = vmatprep.mubr.msk.bf16.mxu0 %vm452_vm1, %v3174_v12  ;;  %v977_v3 = vshll.u32 %v7439_v58, 16  ;;  %v975_v12 = vor.u32 %v973_v2, %v971_v8  ;;  %v3664_v16 = vrot.slane %v7437_v9, 2  ;;  %v7451_v9 = vld [vmem:[%s7983_s29 + $0x60] sm:$0xff]  }
  0xcb   : > { %6688 = vmatprep.mubr.msk.bf16.mxu1 %vm452_vm1, %v916_v6  ;;  %v7434_v6 = vld [vmem:[%s7983_s29 + $0x20] sm:$0xff]   ;;  %v3678_v14 = vrot.slane %v7451_v9, 2 }
  0xcc   : > { %v979_v13 = vrot.slane %v977_v3, 1  ;;  %v3662_v15 = vrot.slane %v7434_v6, 2  ;;  %v7453_v3 = vld [vmem:[%s7983_s29 + $0x20] sm:$0xff]   ;;  %v2083_v6 = vsel %vm507_vm0, %v8150_v22, 0 }
  0xcd   : > { %v289_v59 = vld [vmem:[#allocation8] sm:$0xff] }
  0xce   : > { %v980_v21 = vsel %vm856_vm4, %v975_v12, %v979_v13  ;;  %v3663_v25 = vsel %vm3147_vm3, %v3660_v60, %v3662_v15  ;;  %v3665_v28 = vsel %vm3147_vm3, %v3662_v15, %v3664_v16  ;;  %v7450_v60 = vld [vmem:[%s7983_s29 + $0x58] sm:$0xff]   ;;  %v1487_v12 = vrot.slane %v7453_v3, 1 }
  0xcf   : > { %v3680_v15 = vrot.slane %v7454_v11, 2 }
  0xd1   : > { %6853 = vmatmul.mubr.msk.bf16.gmra.mrb[24].mxu0 %vm452_vm1, %v3176_v29  ;;  %v987_v29 = vrot.slane %v985_v17, 1  ;;  %v7457_v17 = vld [vmem:[%s7983_s29 + $0x30] sm:$0xff]  }
  0xd2   : > { %6689 = vmatmul.mubr.msk.bf16.gmra.mrb[12].mxu1 %vm452_vm1, %v924_v23  ;;  %6856 = vmatprep.mubr.msk.bf16.mxu0 %vm452_vm1, %v3178_v31  ;;  %v989_v23 = vshrl.u32 %v7440_v10, 16  ;;  %v983_v31 = vor.u32 %v981_v20, %v979_v13  ;;  %v7541_v13 = vld [vmem:[#allocation6 + $0x8] sm:$0x3] }
  0xd3   : > { %6692 = vmatprep.mubr.msk.bf16.mxu1 %vm452_vm1, %v932_v26  ;;  %v4396_v26 = vsel %vm507_vm0, %v8112_v32, 0  ;;  %v3666_v32 = vrot.slane %v7438_v19, 2  ;;  %v7460_v19 = vld [vmem:[%s7983_s29 + $0x38] sm:$0xff]  }
  0xd4   : > { %v991_v35 = vor.u32 %v989_v23, %v987_v29  ;;  %v988_v38 = vsel %vm856_vm4, %v983_v31, %v987_v29  ;;  %v3681_v23 = vsel %vm3147_vm3, %v3678_v14, %v3680_v15 }
  0xd5   : > { %v3667_v44 = vsel %vm3147_vm3, %v3664_v16, %v3666_v32  ;;  %v3669_v46 = vsel %vm3147_vm3, %v3666_v32, %v3668_v37  ;;  %v7459_v32 = vld [vmem:[%s7983_s29 + $0x80] sm:$0xff]  }
  0xd6   : > { %v996_v41 = vsel %vm856_vm4, %v991_v35, %v995_v36  ;;  %v7464_v35 = vld [vmem:[%s7983_s29 + $0x48] sm:$0xff]  }
  0xd7   : > { %v1497_v40 = vrot.slane %v7464_v35, 1  ;;  %v296_v35 = vld [vmem:[#allocation8 + $0x38] sm:$0xff] }
  0xd9   : > { %6857 = vmatmul.mubr.msk.bf16.gmra.mrb[28].mxu0 %vm452_vm1, %v3180_v50  ;;  %v1480_v50 = vrot.slane %v7447_v42, 1  ;;  %v7769_v42 = vmov 0  }
  0xda   : > { %6693 = vmatmul.mubr.msk.bf16.gmra.mrb[16].mxu1 %vm452_vm1, %v940_v43  ;;  %6860 = vmatprep.mubr.msk.bf16.mxu0 %vm452_vm1, %v3182_v52  ;;  %v7448_v43 = vld [vmem:[%s7983_s29 + $0x8] sm:$0xff]   ;;  %v3670_v52 = vrot.slane %v7442_v45, 2  ;;  %v7463_v45 = vld [vmem:[%s7983_s29 + $0x90] sm:$0xff]  }
  0xdb   : > { %6696 = vmatprep.mubr.msk.bf16.mxu1 %vm452_vm1, %v948_v47  ;;  %v7445_v47 = vld [vmem:[%s7983_s29 + $0x48] sm:$0xff]   ;;  %v1481_v51 = vrot.slane %v7448_v43, 1  ;;  %7369 = vset.pattern.permute.xlu0 %v7769_v42 }
  0xdc   : > { %v3672_v53 = vrot.slane %v7445_v47, 2  ;;  %v3671_v58 = vsel %vm3147_vm3, %v3668_v37, %v3670_v52  ;;  %v7462_v37 = vld [vmem:[%s7983_s29 + $0x88] sm:$0xff]   ;;  %7370 = vset.pattern.permute.xlu1 %v7769_v42  ;;  %v1498_v47 = vsel %vm1479_vm5, %v1495_v39, %v1497_v40  ;;  %5233 = vperm.xlu0 %7369, %v289_v59   ;;  %v7479_v42 = vld [vmem:[%s7983_s29 + $0x38] sm:$0xff]  }
  0xdd   : > { %v1482_v56 = vsel %vm1479_vm5, %v1480_v50, %v1481_v51  ;;  %v1484_v2 = vsel %vm1479_vm5, %v1481_v51, %v1483_v62  ;;  %v3688_v43 = vrot.slane %v7462_v37, 2  ;;  %v7471_v51 = vld [vmem:[%s7983_s29 + $0x18] sm:$0xff]  }
  0xde   : > { %v3673_v61 = vsel %vm3147_vm3, %v3670_v52, %v3672_v53  ;;  %v3675_v8 = vsel %vm3147_vm3, %v3672_v53, %v3674_v0  ;;  %v7470_v53 = vld [vmem:[%s7983_s29 + $0x10] sm:$0xfc]  }
  0xdf   : > { %v300_v59 = vld [vmem:[#allocation8 + $0x58] sm:$0xff] }
  0xe1   : > { %6861 = vmatmul.mubr.msk.bf16.gmra.mrb[32].mxu0 %vm452_vm1, %v3184_v4 }
  0xe2   : > { %6697 = vmatmul.mubr.msk.bf16.gmra.mrb[20].mxu1 %vm452_vm1, %v956_v63  ;;  %6866 = vmatprep.mubr.msk.bf16.mxu0 %vm452_vm1, %v3661_v7  ;;  %v1485_v63 = vrot.slane %v7452_v57, 1  ;;  %v7456_v7 = vld [vmem:[%s7983_s29 + $0x28] sm:$0xff]   ;;  %v7467_v57 = vld [vmem:[%s7983_s29 + $0xa0] ss:$0 sps:$4 sm:$0x33]  }
  0xe3   : > { %6700 = vmatprep.mubr.msk.bf16.mxu1 %vm452_vm1, %v964_v1  ;;  %v3676_v1 = vrot.slane %v7450_v60, 2  ;;  %v1489_v22 = vrot.slane %v7456_v7, 1  ;;  %v291_v60 = vld [vmem:[#allocation8 + $0x10] sm:$0xff] }
  0xe4   : > { %v1486_v4 = vsel %vm1479_vm5, %v1483_v62, %v1485_v63  ;;  %v1488_v16 = vsel %vm1479_vm5, %v1485_v63, %v1487_v12  ;;  %v7469_v62 = vld [vmem:[%s7983_s29 + $0x60] sm:$0xff]   ;;  %v4172_v63 = vshrl.u32 %v7470_v53, 16  ;;  %5243 = vperm.xlu1 %7370, %v291_v60   ;;  %v7473_v7 = vld [vmem:[%s7983_s29 + $0x68] sm:$0xff]  }
  0xe5   : > { %v3677_v10 = vsel %vm3147_vm3, %v3674_v0, %v3676_v1  ;;  %v3679_v20 = vsel %vm3147_vm3, %v3676_v1, %v3678_v14  ;;  %v4175_v0 = vshll.u32 %v7470_v53, 16  ;;  %v4183_v1 = vshll.u32 %v7471_v51, 16  ;;  %v7475_v14 = vld [vmem:[%s7983_s29 + $0x28] sm:$0xff]  }
  0xe9   : > { %6867 = vmatmul.mubr.msk.bf16.vlgmr.msra.gmra.mrb[0].mxu0 %vm452_vm1, %v3663_v25  ;;  %v1491_v25 = vrot.slane %v7457_v17, 1  ;;  %v293_v17 = vld [vmem:[#allocation8 + $0x20] sm:$0xff] }
  0xea   : > { %6701 = vmatmul.mubr.msk.bf16.gmra.mrb[24].mxu1 %vm452_vm1, %v972_v18  ;;  %6903 = vmatpush3.bf16.msra.mxu0 %v4396_v26  ;;  %v1490_v18 = vsel %vm1479_vm5, %v1487_v12, %v1489_v22  ;;  %v1493_v26 = vrot.slane %v7460_v19, 1  ;;  %v4174_v12 = vrot.slane %v4172_v63, 2  ;;  %v294_v19 = vld [vmem:[#allocation8 + $0x28] sm:$0xff] }
  0xeb   : > { %6704 = vmatprep.mubr.msk.bf16.mxu1 %vm452_vm1, %v980_v21  ;;  %6870 = vmatprep.mubr.msk.bf16.mxu0 %vm452_vm1, %v3665_v28  ;;  %v7455_v21 = vld [vmem:[%s7983_s29 + $0x70] sm:$0xff]   ;;  %v3684_v28 = vrot.slane %v7458_v24, 2  ;;  %v1492_v29 = vsel %vm1479_vm5, %v1489_v22, %v1491_v25  ;;  %v4177_v22 = vrot.slane %v4175_v0, 3  ;;  %v7480_v63 = vld [vmem:[%s7983_s29 + $0x40] sm:$0xff]   ;;  %v7483_v0 = vld [vmem:[%s7983_s29 + $0x48] sm:$0xff]  }
  0xec   : > { %7277 = vmatprep.subr.msk.bf16.mxu0 %vm507_vm0, %v8202_v34  ;;  %v3682_v27 = vrot.slane %v7455_v21, 2  ;;  %v1494_v31 = vsel %vm1479_vm5, %v1491_v25, %v1493_v26  ;;  %v7474_v25 = vld [vmem:[%s7983_s29 + $0x70] sm:$0xff]  }
  0xee   : > { %v3683_v36 = vsel %vm3147_vm3, %v3680_v15, %v3682_v27  ;;  %v3694_v15 = vrot.slane %v7467_v57, 2  ;;  %v4908_v57 = vsel %vm507_vm0, %v8202_v34, 0 }
  0xf1   : > { %6871 = vmatmul.mubr.msk.bf16.gmra.mrb[4].mxu0 %vm452_vm1, %v3667_v44  ;;  %v1496_v44 = vsel %vm1479_vm5, %v1493_v26, %v1495_v39  ;;  %v4198_v26 = vshrl.u32 %v7475_v14, 16 }
  0xf2   : > { %6705 = vmatmul.mubr.msk.bf16.gmra.mrb[28].mxu1 %vm452_vm1, %v988_v38  ;;  %6874 = vmatprep.mubr.msk.bf16.mxu0 %vm452_vm1, %v3669_v46  ;;  %v3685_v38 = vsel %vm3147_vm3, %v3682_v27, %v3684_v28  ;;  %v7465_v46 = vld [vmem:[%s7983_s29 + $0x50] sm:$0xff]   ;;  %v4201_v27 = vshll.u32 %v7475_v14, 16 }
  0xf3   : > { %6708 = vmatprep.mubr.msk.bf16.mxu1 %vm452_vm1, %v996_v41  ;;  %v3686_v41 = vrot.slane %v7459_v32, 2 }
  0xf5   : > { %v3687_v50 = vsel %vm3147_vm3, %v3684_v28, %v3686_v41  ;;  %v3689_v52 = vsel %vm3147_vm3, %v3686_v41, %v3688_v43  ;;  %v4203_v41 = vrot.slane %v4201_v27, 3 }
  0xf9   : > { %6875 = vmatmul.mubr.msk.bf16.gmra.mrb[8].mxu0 %vm452_vm1, %v3671_v58  ;;  %v4180_v58 = vshrl.u32 %v7471_v51, 16  ;;  %v4216_v51 = vshrl.u32 %v7479_v42, 16 }
  0xfa   : > { %6709 = vmatmul.mubr.msk.bf16.gmra.mrb[32].mxu1 %vm452_vm1, %v1004_v54  ;;  %6878 = vmatprep.mubr.msk.bf16.mxu0 %vm452_vm1, %v3673_v61  ;;  %v1499_v54 = vrot.slane %v7465_v46, 1  ;;  %v3692_v61 = vrot.slane %v8276_v48, 2  ;;  %v298_v46 = vld [vmem:[#allocation8 + $0x48] sm:$0xff] }
  0xfb   : > { %6714 = vmatprep.mubr.msk.bf16.mxu1 %vm452_vm1, %v1482_v56  ;;  %v3690_v56 = vrot.slane %v7463_v45, 2  ;;  %v4182_v9 = vrot.slane %v4180_v58, 2 }
  0xfc   : > { %v1500_v3 = vsel %vm1479_vm5, %v1497_v40, %v1499_v54  ;;  %v4200_v40 = vrot.slane %v4198_v26, 2 }
  0xfd   : > { %v3693_v11 = vsel %vm3147_vm3, %v3690_v56, %v3692_v61 }
 0x101   : > { %6879 = vmatmul.mubr.msk.bf16.gmra.mrb[12].mxu0 %vm452_vm1, %v3675_v8  ;;  %v3691_v8 = vsel %vm3147_vm3, %v3688_v43, %v3690_v56  ;;  %v1507_v43 = vrot.slane %v7474_v25, 1  ;;  %v299_v56 = vld [vmem:[#allocation8 + $0x50] sm:$0xff] }
 0x102   : > { %6715 = vmatmul.mubr.msk.bf16.vlgmr.msra.gmra.mrb[0].mxu1 %vm452_vm1, %v1484_v2  ;;  %6882 = vmatprep.mubr.msk.bf16.mxu0 %vm452_vm1, %v3677_v10  ;;  %v290_v2 = vld [vmem:[#allocation8 + $0x8] sm:$0xff]  ;;  %v292_v10 = vld [vmem:[#allocation8 + $0x18] sm:$0xff] }
 0x103   : > { %6718 = vmatprep.mubr.msk.bf16.mxu1 %vm452_vm1, %v1486_v4  ;;  %6751 = vmatpush3.bf16.msra.mxu1 %v2083_v6  ;;  %v1502_v4 = vsel %vm1479_vm5, %v1499_v54, %v1501_v55  ;;  %v7472_v6 = vld [vmem:[%s7983_s29 + $0x20] sm:$0xff]   ;;  %v7484_v25 = vld [vmem:[%s7983_s29 + $0x50] sm:$0xff]  }
 0x104   : > { %7273 = vmatprep.subr.msk.bf16.mxu1 %vm507_vm0, %v7541_v13  ;;  %v4185_v13 = vrot.slane %v4183_v1, 3  ;;  %5238 = vperm.xlu0 %7369, %v290_v2   ;;  %v4192_v21 = vshll.u32 %v7472_v6, 16  ;;  %v7478_v54 = vld [vmem:[%s7983_s29 + $0x80] sm:$0xff]   ;;  %v4218_v2 = vrot.slane %v4216_v51, 2 }
 0x105   : > { %5248 = vperm.xlu1 %7370, %v292_v10   ;;  %v1511_v34 = vrot.slane %v7478_v54, 1  ;;  %v4228_v10 = vshll.u32 %v7480_v63, 16  ;;  %v7489_v51 = vld [vmem:[%s7983_s29 + $0x60] sm:$0xff]  }
 0x106   : > { %v4186_v24 = vor.u32 %v4185_v13, %v4182_v9  ;;  %v4194_v37 = vrot.slane %v4192_v21, 3  ;;  %v4225_v9 = vshrl.u32 %v7480_v63, 16  ;;  %v4237_v13 = vshll.u32 %v7483_v0, 16 }
 0x108   : > { %5253 = vperm.xlu0 %7369, %v293_v17   ;;  %v4227_v21 = vrot.slane %v4225_v9, 2  ;;  %v4239_v27 = vrot.slane %v4237_v13, 3 }
 0x109   : > { %6883 = vmatmul.mubr.msk.bf16.gmra.mrb[16].mxu0 %vm452_vm1, %v3679_v20  ;;  %v4189_v20 = vshrl.u32 %v7472_v6, 16  ;;  %5258 = vperm.xlu1 %7370, %v294_v19   ;;  %v304_v19 = vld [vmem:[#allocation8 + $0x78] sm:$0xff] }
 0x10a   : > { %6719 = vmatmul.mubr.msk.bf16.gmra.mrb[4].mxu1 %vm452_vm1, %v1488_v16  ;;  %6886 = vmatprep.mubr.msk.bf16.mxu0 %vm452_vm1, %v3681_v23  ;;  %v1503_v16 = vrot.slane %v7469_v62, 1  ;;  %v4178_v23 = vor.u32 %v4177_v22, %v4174_v12  ;;  %v4234_v12 = vshrl.u32 %v7483_v0, 16 }
 0x10b   : > { %6722 = vmatprep.mubr.msk.bf16.mxu1 %vm452_vm1, %v1490_v18  ;;  %v1505_v18 = vrot.slane %v7473_v7, 1  ;;  %v4191_v32 = vrot.slane %v4189_v20, 2  ;;  %v302_v7 = vld [vmem:[#allocation8 + $0x68] sm:$0xff] }
 0x10c   : > { %v1504_v28 = vsel %vm1479_vm5, %v1501_v55, %v1503_v16  ;;  %v4187_v39 = vsel %vm4170_vm6, %v4178_v23, %v4186_v24  ;;  %v8319_v55 = vld [vmem:[%s7983_s29 + $0x88] sm:$0xff]   ;;  %v4230_v23 = vrot.slane %v4228_v10, 3  ;;  %v7493_v10 = vld [vmem:[%s7983_s29 + $0x70] sm:$0xff]  }
 0x10d   : > { %v1506_v30 = vsel %vm1479_vm5, %v1503_v16, %v1505_v18  ;;  %5268 = vperm.xlu1 %7370, %v296_v35   ;;  %v1508_v53 = vsel %vm1479_vm5, %v1505_v18, %v1507_v43  ;;  %v1513_v6 = vrot.slane %v8319_v55, 1  ;;  %v303_v16 = vld [vmem:[#allocation8 + $0x70] sm:$0xff] }
 0x10e   : > { %v7485_v18 = vld [vmem:[%s7983_s29 + $0x8] sm:$0xfe]  }
 0x10f   : > { %v1514_v17 = vsel %vm1479_vm5, %v1511_v34, %v1513_v6  ;;  %v7492_v55 = vld [vmem:[%s7983_s29 + $0x68] sm:$0xff]  }
 0x110   : > { %v4270_v0 = vshrl.u32 %v7492_v55, 16 }
 0x111   : > { %6887 = vmatmul.mubr.msk.bf16.gmra.mrb[20].mxu0 %vm452_vm1, %v3683_v36  ;;  %v3695_v36 = vsel %vm3147_vm3, %v3692_v61, %v3694_v15  ;;  %5278 = vperm.xlu1 %7370, %v298_v46   ;;  %v8336_v15 = vld [vmem:[%s7983_s29 + $0x10] sm:$0xff]   ;;  %v7490_v46 = vld [vmem:[%s7983_s29 + $0x20] sm:$0xff]  }
 0x112   : > { %6723 = vmatmul.mubr.msk.bf16.gmra.mrb[8].mxu1 %vm452_vm1, %v1492_v29  ;;  %6890 = vmatprep.mubr.msk.bf16.mxu0 %vm452_vm1, %v3685_v38  ;;  %v295_v29 = vld [vmem:[#allocation8 + $0x30] sm:$0xff]  ;;  %v1992_v35 = vrot.slane %v8336_v15, 1 }
 0x113   : > { %6726 = vmatprep.mubr.msk.bf16.mxu1 %vm452_vm1, %v1494_v31  ;;  %v8305_v31 = vld [vmem:[%s7983_s29 + $0x78] sm:$0xff]   ;;  %v7476_v38 = vld [vmem:[%s7983_s29 + $0x30] sm:$0xff]   ;;  %5263 = vperm.xlu0 %7369, %v295_v29  }
 0x114   : > { %v1509_v45 = vrot.slane %v8305_v31, 1  ;;  %v4207_v48 = vshrl.u32 %v7476_v38, 16  ;;  %v4210_v49 = vshll.u32 %v7476_v38, 16  ;;  %v1991_v31 = vrot.slane %v7485_v18, 1 }
 0x115   : > { %5288 = vperm.xlu1 %7370, %v300_v59   ;;  %v4246_v38 = vshll.u32 %v7484_v25, 16  ;;  %v310_v59 = vld [vmem:[#allocation8 + $0xa8] sm:$0xff] }
 0x116   : > { %v1510_v58 = vsel %vm1479_vm5, %v1507_v43, %v1509_v45  ;;  %v4209_v61 = vrot.slane %v4207_v48, 2  ;;  %v4212_v62 = vrot.slane %v4210_v49, 3  ;;  %v1512_v14 = vsel %vm1479_vm5, %v1509_v45, %v1511_v34  ;;  %v7487_v43 = vld [vmem:[%s7983_s29 + $0x18] sm:$0xff]  }
 0x117   : > { %v1993_v45 = vsel %vm1479_vm5, %v1991_v31, %v1992_v35  ;;  %v311_v34 = vld [vmem:[#allocation8 + $0xb0] sm:$0xff] }
 0x119   : > { %6891 = vmatmul.mubr.msk.bf16.gmra.mrb[24].mxu0 %vm452_vm1, %v3687_v50  ;;  %v4204_v50 = vor.u32 %v4203_v41, %v4200_v40  ;;  %5298 = vperm.xlu1 %7370, %v302_v7  }
 0x11a   : > { %6727 = vmatmul.mubr.msk.bf16.gmra.mrb[12].mxu1 %vm452_vm1, %v1496_v44  ;;  %6894 = vmatprep.mubr.msk.bf16.mxu0 %vm452_vm1, %v3689_v52  ;;  %v297_v44 = vld [vmem:[#allocation8 + $0x40] sm:$0xff]  ;;  %v4219_v52 = vshll.u32 %v7479_v42, 16 }
 0x11b   : > { %6730 = vmatprep.mubr.msk.bf16.mxu1 %vm452_vm1, %v1498_v47  ;;  %v4195_v47 = vor.u32 %v4194_v37, %v4191_v32  ;;  %5273 = vperm.xlu0 %7369, %v297_v44   ;;  %v4231_v32 = vor.u32 %v4230_v23, %v4227_v21  ;;  %v4243_v37 = vshrl.u32 %v7484_v25, 16  ;;  %v307_v44 = vld [vmem:[#allocation8 + $0x90] sm:$0xff]  ;;  %v314_v21 = vld [vmem:[#allocation8 + $0xc8] sm:$0xff] }
 0x11d   : > { %v4196_v60 = vsel %vm4170_vm6, %v4186_v24, %v4195_v47  ;;  %v4205_v1 = vsel %vm4170_vm6, %v4195_v47, %v4204_v50  ;;  %v4236_v24 = vrot.slane %v4234_v12, 2  ;;  %5308 = vperm.xlu1 %7370, %v304_v19   ;;  %v308_v47 = vld [vmem:[#allocation8 + $0x98] sm:$0xff]  ;;  %v4245_v49 = vrot.slane %v4243_v37, 2 }
 0x11e   : > { %v4279_v19 = vshrl.u32 %v7493_v10, 16 }
 0x11f   : > { %5283 = vperm.xlu0 %7369, %v299_v56   ;;  %v1994_v56 = vrot.slane %v7487_v43, 1 }
 0x120   : > { %v4281_v31 = vrot.slane %v4279_v19, 2  ;;  %v324_v19 = vld [vmem:[#allocation8 + $0x118] sm:$0xff] }
 0x121   : > { %6895 = vmatmul.mubr.msk.bf16.gmra.mrb[28].mxu0 %vm452_vm1, %v3691_v8  ;;  %v4213_v8 = vor.u32 %v4212_v62, %v4209_v61  ;;  %v4261_v61 = vshrl.u32 %v7489_v51, 16  ;;  %v4264_v62 = vshll.u32 %v7489_v51, 16 }
 0x122   : > { %6731 = vmatmul.mubr.msk.bf16.gmra.mrb[16].mxu1 %vm452_vm1, %v1500_v3  ;;  %6898 = vmatprep.mubr.msk.bf16.mxu0 %vm452_vm1, %v3693_v11  ;;  %v4221_v3 = vrot.slane %v4219_v52, 3  ;;  %v7482_v11 = vld [vmem:[%s7983_s29 + $0x90] ss:$0 sps:$4 sm:$0x11]  }
 0x123   : > { %6734 = vmatprep.mubr.msk.bf16.mxu1 %vm452_vm1, %v1502_v4  ;;  %v301_v4 = vld [vmem:[#allocation8 + $0x60] sm:$0xff]  ;;  %v4214_v20 = vsel %vm4170_vm6, %v4204_v50, %v4213_v8  ;;  %v1515_v29 = vrot.slane %v7482_v11, 1  ;;  %v4248_v50 = vrot.slane %v4246_v38, 3  ;;  %v4266_v9 = vrot.slane %v4264_v62, 3  ;;  %v312_v11 = vld [vmem:[#allocation8 + $0xb8] sm:$0xff] }
 0x124   : > { %v4222_v22 = vor.u32 %v4221_v3, %v4218_v2  ;;  %5293 = vperm.xlu0 %7369, %v301_v4   ;;  %v1995_v2 = vsel %vm1479_vm5, %v1992_v35, %v1994_v56  ;;  %v7491_v3 = vld [vmem:[%s7983_s29 + $0x28] sm:$0xff]  }
 0x125   : > { %v1516_v42 = vsel %vm1479_vm5, %v1513_v6, %v1515_v29  ;;  %v7494_v6 = vld [vmem:[%s7983_s29 + $0x30] sm:$0xff]   ;;  %v1998_v15 = vrot.slane %v7491_v3, 1  ;;  %v7498_v29 = vld [vmem:[%s7983_s29 + $0x40] sm:$0xff]  }
 0x126   : > { %v4223_v26 = vsel %vm4170_vm6, %v4213_v8, %v4222_v22  ;;  %v4232_v48 = vsel %vm4170_vm6, %v4222_v22, %v4231_v32  ;;  %v4263_v8 = vrot.slane %v4261_v61, 2  ;;  %v4272_v22 = vrot.slane %v4270_v0, 2  ;;  %v7504_v0 = vld [vmem:[%s7983_s29 + $0x98] sm:$0xff]  }
 0x127   : > { %v2004_v43 = vrot.slane %v7498_v29, 1 }
 0x128   : > { %5303 = vperm.xlu0 %7369, %v303_v16   ;;  %v313_v16 = vld [vmem:[#allocation8 + $0xc0] sm:$0xff]  ;;  %v4267_v18 = vor.u32 %v4266_v9, %v4263_v8  ;;  %v4324_v9 = vshrl.u32 %v7504_v0, 16 }
 0x129   : > { %6899 = vmatmul.mubr.msk.bf16.gmra.mrb[32].mxu0 %vm452_vm1, %v3695_v36  ;;  %v306_v36 = vld [vmem:[#allocation8 + $0x88] sm:$0xff] }
 0x12a   : > { %6735 = vmatmul.mubr.msk.bf16.gmra.mrb[20].mxu1 %vm452_vm1, %v1504_v28  ;;  %6904 = vmatprep.mubr.msk.bf16.mxu0 %vm452_vm1, %v4187_v39  ;;  %v7488_v28 = vld [vmem:[%s7983_s29 + $0x58] sm:$0xff]   ;;  %v4240_v39 = vor.u32 %v4239_v27, %v4236_v24 }
 0x12b   : > { %6738 = vmatprep.mubr.msk.bf16.mxu1 %vm452_vm1, %v1506_v30  ;;  %v305_v30 = vld [vmem:[#allocation8 + $0x80] sm:$0xff]  ;;  %v4252_v40 = vshrl.u32 %v7488_v28, 16  ;;  %v4255_v41 = vshll.u32 %v7488_v28, 16  ;;  %5318 = vperm.xlu1 %7370, %v306_v36   ;;  %v315_v27 = vld [vmem:[#allocation8 + $0xd0] sm:$0xff] }
 0x12c   : > { %5313 = vperm.xlu0 %7369, %v305_v30   ;;  %v4241_v52 = vsel %vm4170_vm6, %v4231_v32, %v4240_v39  ;;  %v7497_v36 = vld [vmem:[%s7983_s29 + $0x80] sm:$0xff]  }
 0x12d   : > { %v4257_v54 = vrot.slane %v4255_v41, 3  ;;  %v316_v32 = vld [vmem:[#allocation8 + $0xd8] sm:$0xff] }
 0x12f   : > { %5328 = vperm.xlu1 %7370, %v308_v47   ;;  %v318_v47 = vld [vmem:[#allocation8 + $0xe8] sm:$0xff] }
 0x130   : > { %5323 = vperm.xlu0 %7369, %v307_v44  }
 0x131   : > { %6905 = vmatmul.mubr.msk.bf16.vlgmr.msra.gmra.mrb[0].mxu0 %vm452_vm1, %v4196_v60  ;;  %v4249_v60 = vor.u32 %v4248_v50, %v4245_v49 }
 0x132   : > { %6739 = vmatmul.mubr.msk.bf16.gmra.mrb[24].mxu1 %vm452_vm1, %v1508_v53  ;;  %6941 = vmatpush3.bf16.msra.mxu0 %v4908_v57  ;;  %v4254_v53 = vrot.slane %v4252_v40, 2  ;;  %v309_v57 = vld [vmem:[#allocation8 + $0xa0] sm:$0xff] }
 0x133   : > { %6742 = vmatprep.mubr.msk.bf16.mxu1 %vm452_vm1, %v1510_v58  ;;  %6908 = vmatprep.mubr.msk.bf16.mxu0 %vm452_vm1, %v4205_v1  ;;  %v1996_v58 = vrot.slane %v7490_v46, 1  ;;  %v4273_v1 = vshll.u32 %v7492_v55, 16  ;;  %v4250_v7 = vsel %vm4170_vm6, %v4240_v39, %v4249_v60  ;;  %v7500_v40 = vld [vmem:[%s7983_s29 + $0x88] sm:$0xff]   ;;  %v4300_v46 = vshll.u32 %v7497_v36, 16  ;;  %v7502_v55 = vld [vmem:[%s7983_s29 + $0x50] sm:$0xff]  }
 0x134   : > { %v4258_v63 = vor.u32 %v4257_v54, %v4254_v53  ;;  %5333 = vperm.xlu0 %7369, %v309_v57   ;;  %5338 = vperm.xlu1 %7370, %v310_v59   ;;  %v4306_v49 = vshrl.u32 %v7500_v40, 16  ;;  %v4309_v50 = vshll.u32 %v7500_v40, 16  ;;  %v319_v53 = vld [vmem:[#allocation8 + $0xf0] sm:$0xff]  ;;  %v2008_v3 = vrot.slane %v7502_v55, 1 }
 0x135   : > { %v1997_v4 = vsel %vm1479_vm5, %v1994_v56, %v1996_v58  ;;  %v4275_v13 = vrot.slane %v4273_v1, 3  ;;  %v7501_v59 = vld [vmem:[%s7983_s29 + $0x90] sm:$0xff]   ;;  %v7509_v40 = vld [vmem:[%s7983_s29 + $0x18] sm:$0xff]  }
 0x136   : > { %v4259_v12 = vsel %vm4170_vm6, %v4249_v60, %v4258_v63  ;;  %v4268_v30 = vsel %vm4170_vm6, %v4258_v63, %v4267_v18  ;;  %v320_v60 = vld [vmem:[#allocation8 + $0xf8] sm:$0xff]  ;;  %v4308_v62 = vrot.slane %v4306_v49, 2  ;;  %v4311_v63 = vrot.slane %v4309_v50, 3 }
 0x137   : > { %v4276_v23 = vor.u32 %v4275_v13, %v4272_v22  ;;  %v323_v22 = vld [vmem:[#allocation8 + $0x110] sm:$0xff] }
 0x138   : > { %5343 = vperm.xlu0 %7369, %v311_v34   ;;  %5348 = vperm.xlu1 %7370, %v312_v11   ;;  %v4312_v8 = vor.u32 %v4311_v63, %v4308_v62  ;;  %v7515_v49 = vld [vmem:[%s7983_s29 + $0x80] sm:$0xff]  }
 0x139   : > { %6909 = vmatmul.mubr.msk.bf16.gmra.mrb[4].mxu0 %vm452_vm1, %v4214_v20  ;;  %v4282_v20 = vshll.u32 %v7493_v10, 16  ;;  %v4277_v37 = vsel %vm4170_vm6, %v4267_v18, %v4276_v23  ;;  %v4327_v10 = vshll.u32 %v7504_v0, 16  ;;  %v7505_v18 = vld [vmem:[%s7983_s29 + $0xa0] ss:$0 sps:$4 sm:$0x77]   ;;  %v2020_v55 = vrot.slane %v7515_v49, 1 }
 0x13a   : > { %6743 = vmatmul.mubr.msk.bf16.gmra.mrb[28].mxu1 %vm452_vm1, %v1512_v14  ;;  %6912 = vmatprep.mubr.msk.bf16.mxu0 %vm452_vm1, %v4223_v26  ;;  %v7496_v14 = vld [vmem:[%s7983_s29 + $0x78] sm:$0xff]   ;;  %v7523_v62 = vld [vmem:[%s7983_s29 + $0x60] sm:$0xff]   ;;  %v7514_v0 = vld [vmem:[%s7983_s29 + $0x30] sm:$0xff]  }
 0x13b   : > { %6746 = vmatprep.mubr.msk.bf16.mxu1 %vm452_vm1, %v1514_v17  ;;  %v2000_v17 = vrot.slane %v7494_v6, 1  ;;  %v4288_v24 = vshrl.u32 %v7496_v14, 16  ;;  %v4291_v25 = vshll.u32 %v7496_v14, 16  ;;  %v7495_v26 = vld [vmem:[%s7983_s29 + $0x38] sm:$0xff]   ;;  %v4284_v35 = vrot.slane %v4282_v20, 3  ;;  %v7506_v14 = vld [vmem:[%s7983_s29 + $0x60] sm:$0xff]  }
 0x13c   : > { %5353 = vperm.xlu0 %7369, %v313_v16   ;;  %5358 = vperm.xlu1 %7370, %v314_v21   ;;  %v2002_v41 = vrot.slane %v7495_v26, 1  ;;  %v4318_v6 = vshll.u32 %v7501_v59, 16  ;;  %v4326_v21 = vrot.slane %v4324_v9, 2  ;;  %v4333_v26 = vshrl.u32 %v7505_v18, 16 }
 0x13d   : > { %v2001_v28 = vsel %vm1479_vm5, %v1998_v15, %v2000_v17  ;;  %v4290_v38 = vrot.slane %v4288_v24, 2  ;;  %v4293_v39 = vrot.slane %v4291_v25, 3  ;;  %v4285_v44 = vor.u32 %v4284_v35, %v4281_v31  ;;  %v7511_v35 = vld [vmem:[%s7983_s29 + $0x70] sm:$0xff]  }
 0x13e   : > { %v2003_v51 = vsel %vm1479_vm5, %v2000_v17, %v2002_v41  ;;  %v2005_v54 = vsel %vm1479_vm5, %v2002_v41, %v2004_v43  ;;  %v4320_v17 = vrot.slane %v4318_v6, 3  ;;  %v2012_v25 = vrot.slane %v7506_v14, 1  ;;  %v7527_v14 = vld [vmem:[%s7983_s29 + $0x70] sm:$0xff]  }
 0x13f   : > { %v4286_v56 = vsel %vm4170_vm6, %v4276_v23, %v4285_v44  ;;  %v4329_v23 = vrot.slane %v4327_v10, 3  ;;  %v2605_v6 = vshll.u32 %v7523_v62, 16  ;;  %v7520_v10 = vld [vmem:[%s7983_s29 + $0x98] ss:$0 sps:$4 sm:$0x11]  }
 0x140   : > { %5363 = vperm.xlu0 %7369, %v315_v27   ;;  %5368 = vperm.xlu1 %7370, %v316_v32   ;;  %v4336_v27 = vshll.u32 %v7505_v18, 16  ;;  %v4335_v32 = vrot.slane %v4333_v26, 2  ;;  %v7521_v18 = vld [vmem:[%s7983_s29 + $0x48] sm:$0xff]  }
 0x141   : > { %6913 = vmatmul.mubr.msk.bf16.gmra.mrb[8].mxu0 %vm452_vm1, %v4232_v48  ;;  %v4294_v48 = vor.u32 %v4293_v39, %v4290_v38  ;;  %v7508_v39 = vld [vmem:[%s7983_s29 + $0x10] sm:$0xf8]   ;;  %v4829_v26 = vrot.slane %v7521_v18, 3 }
 0x142   : > { %6747 = vmatmul.mubr.msk.bf16.gmra.mrb[32].mxu1 %vm452_vm1, %v1516_v42  ;;  %6916 = vmatprep.mubr.msk.bf16.mxu0 %vm452_vm1, %v4241_v52  ;;  %v317_v42 = vld [vmem:[#allocation8 + $0xe0] sm:$0xff] }
 0x143   : > { %6752 = vmatprep.mubr.msk.bf16.mxu1 %vm452_vm1, %v1993_v45  ;;  %v4297_v45 = vshrl.u32 %v7497_v36, 16  ;;  %v7499_v52 = vld [vmem:[%s7983_s29 + $0x48] sm:$0xff]   ;;  %v4295_v61 = vsel %vm4170_vm6, %v4285_v44, %v4294_v48  ;;  %v4816_v44 = vrot.slane %v7508_v39, 3 }
 0x144   : > { %5373 = vperm.xlu0 %7369, %v317_v42   ;;  %5378 = vperm.xlu1 %7370, %v318_v47   ;;  %v2006_v1 = vrot.slane %v7499_v52, 1  ;;  %v2016_v42 = vrot.slane %v7511_v35, 1  ;;  %v7512_v47 = vld [vmem:[%s7983_s29 + $0x78] sm:$0xff]  }
 0x145   : > { %v4299_v57 = vrot.slane %v4297_v45, 2  ;;  %v4817_v45 = vrot.slane %v7509_v40, 3  ;;  %v7525_v40 = vld [vmem:[%s7983_s29 + $0x58] sm:$0xff]  }
 0x146   : > { %v2007_v11 = vsel %vm1479_vm5, %v2004_v43, %v2006_v1  ;;  %v2009_v13 = vsel %vm1479_vm5, %v2006_v1, %v2008_v3 }
 0x147   : > { %v4818_v52 = vsel %vm4815_vm7, %v4816_v44, %v4817_v45 }
 0x148   : > { %5383 = vperm.xlu0 %7369, %v319_v53   ;;  %5388 = vperm.xlu1 %7370, %v320_v60   ;;  %v7513_v53 = vld [vmem:[%s7983_s29 + $0x28] sm:$0xff]  }
 0x149   : > { %6917 = vmatmul.mubr.msk.bf16.gmra.mrb[12].mxu0 %vm452_vm1, %v4250_v7  ;;  %v322_v7 = vld [vmem:[#allocation8 + $0x108] sm:$0xff] }
 0x14a   : > { %6753 = vmatmul.mubr.msk.bf16.vlgmr.msra.gmra.mrb[0].mxu1 %vm452_vm1, %v1995_v2  ;;  %6920 = vmatprep.mubr.msk.bf16.mxu0 %vm452_vm1, %v4259_v12  ;;  %v321_v2 = vld [vmem:[#allocation8 + $0x100] sm:$0xff] }
 0x14b   : > { %6756 = vmatprep.mubr.msk.bf16.mxu1 %vm452_vm1, %v1997_v4  ;;  %6979 = vmatpush3.bf16.msra.mxu1 %v8000_v5  ;;  %v1999_v5 = vsel %vm1479_vm5, %v1996_v58, %v1998_v15  ;;  %v4302_v58 = vrot.slane %v4300_v46, 3  ;;  %v4315_v4 = vshrl.u32 %v7501_v59, 16  ;;  %v7503_v12 = vld [vmem:[%s7983_s29 + $0x58] sm:$0xff]   ;;  %v7516_v59 = vld [vmem:[%s7983_s29 + $0x88] sm:$0xff]  }
 0x14c   : > { %5393 = vperm.xlu0 %7369, %v321_v2   ;;  %5398 = vperm.xlu1 %7370, %v322_v7   ;;  %v2010_v24 = vrot.slane %v7503_v12, 1  ;;  %v7517_v2 = vld [vmem:[%s7983_s29 + $0x38] sm:$0xff]   ;;  %v4823_v7 = vrot.slane %v7514_v0, 3 }
 0x14d   : > { %v4303_v34 = vor.u32 %v4302_v58, %v4299_v57  ;;  %v4317_v16 = vrot.slane %v4315_v4, 2  ;;  %v4821_v57 = vrot.slane %v7513_v53, 3  ;;  %v2602_v4 = vshrl.u32 %v7523_v62, 16 }
 0x14e   : > { %v2011_v29 = vsel %vm1479_vm5, %v2008_v3, %v2010_v24  ;;  %v2013_v31 = vsel %vm1479_vm5, %v2010_v24, %v2012_v25  ;;  %v2022_v3 = vrot.slane %v7516_v59, 1  ;;  %v2620_v24 = vshrl.u32 %v7527_v14, 16  ;;  %v7529_v59 = vld [vmem:[%s7983_s29 + $0x68] sm:$0xff]  }
 0x14f   : > { %v4304_v15 = vsel %vm4170_vm6, %v4294_v48, %v4303_v34  ;;  %v4313_v20 = vsel %vm4170_vm6, %v4303_v34, %v4312_v8 }
 0x150   : > { %5403 = vperm.xlu0 %7369, %v323_v22   ;;  %5408 = vperm.xlu1 %7370, %v324_v19   ;;  %v2023_v9 = vsel %vm1479_vm5, %v2020_v55, %v2022_v3  ;;  %v2604_v22 = vrot.slane %v2602_v4, 1  ;;  %v2026_v19 = vrot.slane %v7520_v10, 1  ;;  %v2622_v35 = vrot.slane %v2620_v24, 1 }
 0x151   : > { %6921 = vmatmul.mubr.msk.bf16.gmra.mrb[16].mxu0 %vm452_vm1, %v4268_v30  ;;  %v7507_v30 = vld [vmem:[%s7983_s29 + $0x68] sm:$0xff]  }
 0x152   : > { %6757 = vmatmul.mubr.msk.bf16.gmra.mrb[4].mxu1 %vm452_vm1, %v1999_v5  ;;  %6924 = vmatprep.mubr.msk.bf16.mxu0 %vm452_vm1, %v4277_v37  ;;  %v4321_v5 = vor.u32 %v4320_v17, %v4317_v16  ;;  %v4338_v37 = vrot.slane %v4336_v27, 3  ;;  %v2014_v41 = vrot.slane %v7507_v30, 1  ;;  %v7518_v16 = vld [vmem:[%s7983_s29 + $0x40] sm:$0xff]   ;;  %v7528_v30 = vld [vmem:[%s7983_s29 + $0x78] sm:$0xff]  }
 0x153   : > { %6760 = vmatprep.mubr.msk.bf16.mxu1 %vm452_vm1, %v2001_v28  ;;  %v4330_v28 = vor.u32 %v4329_v23, %v4326_v21 }
 0x154   : > { %v4322_v36 = vsel %vm4170_vm6, %v4312_v8, %v4321_v5  ;;  %v4339_v43 = vor.u32 %v4338_v37, %v4335_v32  ;;  %v2015_v46 = vsel %vm1479_vm5, %v2012_v25, %v2014_v41  ;;  %v2017_v48 = vsel %vm1479_vm5, %v2014_v41, %v2016_v42  ;;  %v7531_v32 = vld [vmem:[%s7983_s29 + $0x80] sm:$0xff]  }
 0x155   : > { %v4331_v38 = vsel %vm4170_vm6, %v4321_v5, %v4330_v28  ;;  %v4825_v8 = vrot.slane %v7517_v2, 3  ;;  %v2623_v25 = vshll.u32 %v7527_v14, 16  ;;  %v4827_v5 = vrot.slane %v7518_v16, 3 }
 0x156   : > { %v4340_v50 = vsel %vm4170_vm6, %v4330_v28, %v4339_v43  ;;  %v2632_v43 = vshll.u32 %v7528_v30, 16  ;;  %v2638_v44 = vshrl.u32 %v7531_v32, 16 }
 0x157   : > { %v4826_v17 = vsel %vm4815_vm7, %v4823_v7, %v4825_v8  ;;  %v4828_v37 = vsel %vm4815_vm7, %v4825_v8, %v4827_v5  ;;  %v4830_v39 = vsel %vm4815_vm7, %v4827_v5, %v4829_v26  ;;  %v7534_v5 = vld [vmem:[%s7983_s29 + $0x80] sm:$0xff]  }
 0x158   : > { %v2640_v53 = vrot.slane %v2638_v44, 1 }
 0x159   : > { %6925 = vmatmul.mubr.msk.bf16.gmra.mrb[20].mxu0 %vm452_vm1, %v4286_v56 }
 0x15a   : > { %6761 = vmatmul.mubr.msk.bf16.gmra.mrb[8].mxu1 %vm452_vm1, %v2003_v51  ;;  %6928 = vmatprep.mubr.msk.bf16.mxu0 %vm452_vm1, %v4295_v61  ;;  %v7510_v51 = vld [vmem:[%s7983_s29 + $0x20] sm:$0xff]   ;;  %v7519_v61 = vld [vmem:[%s7983_s29 + $0x90] sm:$0xff]  }
 0x15b   : > { %6764 = vmatprep.mubr.msk.bf16.mxu1 %vm452_vm1, %v2005_v54  ;;  %v2018_v54 = vrot.slane %v7512_v47, 1  ;;  %v4819_v56 = vrot.slane %v7510_v51, 3  ;;  %v2024_v34 = vrot.slane %v7519_v61, 1  ;;  %v4833_v47 = vrot.slane %v7525_v40, 3  ;;  %v7532_v51 = vld [vmem:[%s7983_s29 + $0x88] sm:$0xff]  }
 0x15c   : > { %v2647_v61 = vshrl.u32 %v7532_v51, 16  ;;  %v2650_v62 = vshll.u32 %v7532_v51, 16 }
 0x15d   : > { %v2019_v58 = vsel %vm1479_vm5, %v2016_v42, %v2018_v54  ;;  %v2021_v60 = vsel %vm1479_vm5, %v2018_v54, %v2020_v55  ;;  %v4820_v63 = vsel %vm4815_vm7, %v4817_v45, %v4819_v56  ;;  %v4822_v1 = vsel %vm4815_vm7, %v4819_v56, %v4821_v57  ;;  %v7535_v55 = vld [vmem:[%s7983_s29 + $0x90] sm:$0xff]  }
 0x15e   : > { %v2025_v12 = vsel %vm1479_vm5, %v2022_v3, %v2024_v34  ;;  %v2027_v27 = vsel %vm1479_vm5, %v2024_v34, %v2026_v19  ;;  %v2629_v42 = vshrl.u32 %v7528_v30, 16  ;;  %v2641_v45 = vshll.u32 %v7531_v32, 16 }
 0x15f   : > { %v2656_v0 = vshrl.u32 %v7535_v55, 16  ;;  %v4837_v3 = vrot.slane %v7529_v59, 3  ;;  %v2649_v4 = vrot.slane %v2647_v61, 1 }
 0x160   : > { %v2631_v49 = vrot.slane %v2629_v42, 1  ;;  %v2643_v54 = vrot.slane %v2641_v45, 2 }
 0x161   : > { %6929 = vmatmul.mubr.msk.bf16.gmra.mrb[24].mxu0 %vm452_vm1, %v4304_v15  ;;  %v4824_v15 = vsel %vm4815_vm7, %v4821_v57, %v4823_v7  ;;  %v7526_v57 = vld [vmem:[%s7983_s29 + $0x60] sm:$0xff]   ;;  %v7536_v7 = vld [vmem:[%s7983_s29 + $0x98] ss:$0 sps:$4 sm:$0x33]  }
 0x162   : > { %6765 = vmatmul.mubr.msk.bf16.gmra.mrb[12].mxu1 %vm452_vm1, %v2007_v11  ;;  %6932 = vmatprep.mubr.msk.bf16.mxu0 %vm452_vm1, %v4313_v20  ;;  %v7524_v11 = vld [vmem:[%s7983_s29 + $0x68] sm:$0xff]   ;;  %v4835_v2 = vrot.slane %v7526_v57, 3  ;;  %v2668_v16 = vshll.u32 %v7536_v7, 16 }
 0x163   : > { %6768 = vmatprep.mubr.msk.bf16.mxu1 %vm452_vm1, %v2009_v13  ;;  %v2607_v13 = vrot.slane %v2605_v6, 2  ;;  %v2611_v20 = vshrl.u32 %v7524_v11, 16  ;;  %v2614_v21 = vshll.u32 %v7524_v11, 16  ;;  %v2652_v6 = vrot.slane %v2650_v62, 2 }
 0x164   : > { %v4836_v11 = vsel %vm4815_vm7, %v4833_v47, %v4835_v2 }
 0x165   : > { %v2608_v23 = vor.u32 %v2607_v13, %v2604_v22  ;;  %v2613_v28 = vrot.slane %v2611_v20, 1  ;;  %v4838_v22 = vsel %vm4815_vm7, %v4835_v2, %v4837_v3  ;;  %v7533_v13 = vld [vmem:[%s7983_s29 + $0x78] sm:$0xff]   ;;  %v2653_v14 = vor.u32 %v2652_v6, %v2649_v4 }
 0x166   : > { %v4841_v19 = vrot.slane %v7533_v13, 3 }
 0x169   : > { %6933 = vmatmul.mubr.msk.bf16.gmra.mrb[28].mxu0 %vm452_vm1, %v4322_v36  ;;  %v2625_v36 = vrot.slane %v2623_v25, 2 }
 0x16a   : > { %6769 = vmatmul.mubr.msk.bf16.gmra.mrb[16].mxu1 %vm452_vm1, %v2011_v29  ;;  %6936 = vmatprep.mubr.msk.bf16.mxu0 %vm452_vm1, %v4331_v38  ;;  %v2616_v29 = vrot.slane %v2614_v21, 2  ;;  %v7522_v38 = vld [vmem:[%s7983_s29 + $0x50] sm:$0xff]  }
 0x16b   : > { %6772 = vmatprep.mubr.msk.bf16.mxu1 %vm452_vm1, %v2013_v31  ;;  %v2609_v31 = vsel %vm2502_vm2, %v8058_v33, %v2608_v23  ;;  %v2626_v33 = vor.u32 %v2625_v36, %v2622_v35  ;;  %v7538_v36 = vld [vmem:[%s7983_s29 + $0x90] sm:$0xff]  }
 0x16c   : > { %v2617_v41 = vor.u32 %v2616_v29, %v2613_v28  ;;  %v4843_v29 = vrot.slane %v7534_v5, 3 }
 0x16e   : > { %v4844_v35 = vsel %vm4815_vm7, %v4841_v19, %v4843_v29 }
 0x171   : > { %6937 = vmatmul.mubr.msk.bf16.gmra.mrb[32].mxu0 %vm452_vm1, %v4340_v50  ;;  %v2634_v50 = vrot.slane %v2632_v43, 2 }
 0x172   : > { %6773 = vmatmul.mubr.msk.bf16.gmra.mrb[20].mxu1 %vm452_vm1, %v2015_v46  ;;  %6942 = vmatprep.mubr.msk.bf16.mxu0 %vm452_vm1, %v4818_v52  ;;  %v4831_v46 = vrot.slane %v7522_v38, 3  ;;  %v2627_v52 = vsel %vm2502_vm2, %v2617_v41, %v2626_v33  ;;  %v4847_v38 = vrot.slane %v7538_v36, 3 }
 0x173   : > { %6776 = vmatprep.mubr.msk.bf16.mxu1 %vm452_vm1, %v2017_v48  ;;  %v2618_v48 = vsel %vm2502_vm2, %v2608_v23, %v2617_v41  ;;  %v2670_v23 = vrot.slane %v2668_v16, 2  ;;  %v7540_v41 = vld [vmem:[%s7983_s29 + $0xa0] ss:$0 sps:$4 sm:$0x77]  }
 0x174   : > { %v4832_v56 = vsel %vm4815_vm7, %v4829_v26, %v4831_v46  ;;  %v4851_v43 = vrot.slane %v7540_v41, 3 }
 0x179   : > { %6943 = vmatmul.mubr.msk.bf16.vlgmr.msra.gmra.mrb[0].mxu0 %vm452_vm1, %v4820_v63  ;;  %v2644_v63 = vor.u32 %v2643_v54, %v2640_v53  ;;  %v5244_v53 = vpop.permute.xlu1 %5243 }
 0x17a   : > { %6777 = vmatmul.mubr.msk.bf16.gmra.mrb[24].mxu1 %vm452_vm1, %v2019_v58  ;;  %6946 = vmatprep.mubr.msk.bf16.mxu0 %vm452_vm1, %v4822_v1  ;;  %v4834_v58 = vsel %vm4815_vm7, %v4831_v46, %v4833_v47  ;;  %v2659_v1 = vshll.u32 %v7535_v55, 16 }
 0x17b   : > { %6780 = vmatprep.mubr.msk.bf16.mxu1 %vm452_vm1, %v2021_v60  ;;  %v2635_v60 = vor.u32 %v2634_v50, %v2631_v49  ;;  %v2654_v20 = vsel %vm2502_vm2, %v2644_v63, %v2653_v14 }
 0x17c   : > { %v2661_v10 = vrot.slane %v2659_v1, 2 }
 0x17d   : > { %v2636_v34 = vsel %vm2502_vm2, %v2626_v33, %v2635_v60  ;;  %v2645_v8 = vsel %vm2502_vm2, %v2635_v60, %v2644_v63 }
 0x181   : > { %6947 = vmatmul.mubr.msk.bf16.gmra.mrb[4].mxu0 %vm452_vm1, %v4824_v15  ;;  %v2665_v15 = vshrl.u32 %v7536_v7, 16 }
 0x182   : > { %6781 = vmatmul.mubr.msk.bf16.gmra.mrb[28].mxu1 %vm452_vm1, %v2023_v9  ;;  %6950 = vmatprep.mubr.msk.bf16.mxu0 %vm452_vm1, %v4826_v17  ;;  %v2658_v9 = vrot.slane %v2656_v0, 1 }
 0x183   : > { %6784 = vmatprep.mubr.msk.bf16.mxu1 %vm452_vm1, %v2025_v12  ;;  %v7530_v12 = vld [vmem:[%s7983_s29 + $0x70] sm:$0xff]   ;;  %v2667_v21 = vrot.slane %v2665_v15, 1 }
 0x184   : > { %v2662_v17 = vor.u32 %v2661_v10, %v2658_v9  ;;  %v4839_v18 = vrot.slane %v7530_v12, 3  ;;  %v5249_v57 = vpop.permute.xlu1 %5248 }
 0x185   : > { %v2671_v28 = vor.u32 %v2670_v23, %v2667_v21 }
 0x186   : > { %v2663_v24 = vsel %vm2502_vm2, %v2653_v14, %v2662_v17  ;;  %v4840_v25 = vsel %vm4815_vm7, %v4837_v3, %v4839_v18  ;;  %v4842_v26 = vsel %vm4815_vm7, %v4839_v18, %v4841_v19 }
 0x188   : > { %v8530_v61 = vpop.permute.xlu1 %5258 }
 0x189   : > { %6951 = vmatmul.mubr.msk.bf16.gmra.mrb[8].mxu0 %vm452_vm1, %v4828_v37  ;;  %v7539_v37 = vld [vmem:[%s7983_s29 + $0x98] sm:$0xff]  }
 0x18a   : > { %6785 = vmatmul.mubr.msk.bf16.gmra.mrb[32].mxu1 %vm452_vm1, %v2027_v27  ;;  %6954 = vmatprep.mubr.msk.bf16.mxu0 %vm452_vm1, %v4830_v39  ;;  %v7537_v27 = vld [vmem:[%s7983_s29 + $0x88] sm:$0xff]   ;;  %v4849_v39 = vrot.slane %v7539_v37, 3 }
 0x18b   : > { %6810 = vmatprep.mubr.msk.bf16.mxu1 %vm452_vm1, %v2609_v31  ;;  %v4845_v30 = vrot.slane %v7537_v27, 3  ;;  %v2672_v31 = vsel %vm2502_vm2, %v2662_v17, %v2671_v28 }
 0x18c   : > { %v4850_v42 = vsel %vm4815_vm7, %v4847_v38, %v4849_v39  ;;  %v4852_v33 = vsel %vm4815_vm7, %v4849_v39, %v4851_v43  ;;  %v5269_v3 = vpop.permute.xlu1 %5268 }
 0x18d   : > { %v4846_v32 = vsel %vm4815_vm7, %v4843_v29, %v4845_v30  ;;  %v4848_v40 = vsel %vm4815_vm7, %v4845_v30, %v4847_v38 }
 0x190   : > { %v8550_v9 = vpop.permute.xlu1 %5278 }
 0x191   : > { %6955 = vmatmul.mubr.msk.bf16.gmra.mrb[12].mxu0 %vm452_vm1, %v4832_v56 }
 0x192   : > { %6811 = vmatmul.mubr.msk.bf16.vlgmr.msra.gmra.mrb[20].mxu1 %vm452_vm1, %v2618_v48  ;;  %6958 = vmatprep.mubr.msk.bf16.mxu0 %vm452_vm1, %v4834_v58  ;;  %v5234_v48 = vpop.permute.xlu0 %5233 }
 0x193   : > { %6814 = vmatprep.mubr.msk.bf16.mxu1 %vm452_vm1, %v2627_v52 }
 0x196   : > { %v5239_v54 = vpop.permute.xlu0 %5238 }
 0x199   : > { %6959 = vmatmul.mubr.msk.bf16.gmra.mrb[16].mxu0 %vm452_vm1, %v4836_v11  ;;  %v8554_v11 = vpop.permute.xlu1 %5288 }
 0x19a   : > { %6815 = vmatmul.mubr.msk.bf16.gmra.mrb[24].mxu1 %vm452_vm1, %v2636_v34  ;;  %6962 = vmatprep.mubr.msk.bf16.mxu0 %vm452_vm1, %v4838_v22  ;;  %v5254_v59 = vpop.permute.xlu0 %5253 }
 0x19b   : > { %6818 = vmatprep.mubr.msk.bf16.mxu1 %vm452_vm1, %v2645_v8 }
 0x19d   : > { %v8558_v22 = vpop.permute.xlu1 %5298 }
 0x19e   : > { %v5264_v63 = vpop.permute.xlu0 %5263 }
 0x1a1   : > { %6963 = vmatmul.mubr.msk.bf16.gmra.mrb[20].mxu0 %vm452_vm1, %v4840_v25  ;;  %v8563_v21 = vpop.permute.xlu1 %5308 }
 0x1a2   : > { %6819 = vmatmul.mubr.msk.bf16.gmra.mrb[28].mxu1 %vm452_vm1, %v2654_v20  ;;  %6966 = vmatprep.mubr.msk.bf16.mxu0 %vm452_vm1, %v4842_v26  ;;  %v8540_v34 = vpop.permute.xlu0 %5273 }
 0x1a3   : > { %6822 = vmatprep.mubr.msk.bf16.mxu1 %vm452_vm1, %v2663_v24 }
 0x1a6   : > { %v8552_v10 = vpop.permute.xlu0 %5283 }
 0x1a9   : > { %6967 = vmatmul.mubr.msk.bf16.gmra.mrb[24].mxu0 %vm452_vm1, %v4844_v35 }
 0x1aa   : > { %6823 = vmatmul.mubr.msk.bf16.gmra.mrb[32].mxu1 %vm452_vm1, %v2672_v31  ;;  %6970 = vmatprep.mubr.msk.bf16.mxu0 %vm452_vm1, %v4846_v32  ;;  %v8556_v12 = vpop.permute.xlu0 %5293  ;;  %v8570_v38 = vpop.permute.xlu1 %5318 }
 0x1ae   : > { %v8560_v13 = vpop.permute.xlu0 %5303 }
 0x1b1   : > { %6971 = vmatmul.mubr.msk.bf16.gmra.mrb[28].mxu0 %vm452_vm1, %v4848_v40 }
 0x1b2   : > { %6974 = vmatprep.mubr.msk.bf16.mxu0 %vm452_vm1, %v4850_v42  ;;  %v8565_v25 = vpop.permute.xlu0 %5313 }
 0x1b9   : > { %6975 = vmatmul.mubr.msk.bf16.gmra.mrb[32].mxu0 %vm452_vm1, %v4852_v33  ;;  %v8573_v33 = vpop.permute.xlu0 %5323 }
 0x21d   : > { %v6754_v44 = vpop.f32.mrb[0].mxu1 }
 0x21e   : > { %v2119_v45 = vpop.f32.mrb[1].mxu1 }
 0x21f   : > { %v6755_v46 = vpop.f32.mrb[2].mxu1 }
 0x220   : > { %v2122_v47 = vpop.f32.mrb[3].mxu1 }
 0x225   : > { %v6758_v49 = vpop.f32.mrb[4].mxu1 }
 0x226   : > { %v2135_v50 = vpop.f32.mrb[5].mxu1 }
 0x227   : > { %v6759_v51 = vpop.f32.mrb[6].mxu1 }
 0x228   : > { %v8520_v52 = vpop.f32.mrb[7].mxu1 }
 0x22d   : > { %v8522_v55 = vpop.f32.mrb[8].mxu1 }
 0x22e   : > { %v8524_v56 = vpop.f32.mrb[9].mxu1 }
 0x22f   : > { %v8526_v58 = vpop.f32.mrb[10].mxu1 }
 0x230   : > { %v8528_v60 = vpop.f32.mrb[11].mxu1 }
 0x235   : > { %v8532_v62 = vpop.f32.mrb[12].mxu1 }
 0x236   : > { %v8534_v0 = vpop.f32.mrb[13].mxu1 }
 0x237   : > { %v8536_v1 = vpop.f32.mrb[14].mxu1 }
 0x238   : > { %v8538_v2 = vpop.f32.mrb[15].mxu1 }
 0x23d   : > { %v8542_v4 = vpop.f32.mrb[16].mxu1 }
 0x23e   : > { %v8544_v6 = vpop.f32.mrb[17].mxu1 }
 0x23f   : > { %v8546_v7 = vpop.f32.mrb[18].mxu1 }
 0x240   : > { %v8548_v8 = vpop.f32.mrb[19].mxu1 }
 0x24c   : > { %v6944_v14 = vpop.f32.mrb[0].mxu0 }
 0x24d   : > { %v6980_v15 = vadd.f32 %v6944_v14, %v6754_v44  ;;  %v4944_v16 = vpop.f32.mrb[1].mxu0 }
 0x24e   : > { %v6981_v17 = vadd.f32 %v4944_v16, %v2119_v45  ;;  %v6945_v18 = vpop.f32.mrb[2].mxu0 }
 0x24f   : > { %v6982_v19 = vadd.f32 %v6945_v18, %v6755_v46  ;;  %v4947_v20 = vpop.f32.mrb[3].mxu0  ;;  %v5413_v5 = vmul.f32 %v6980_v15, %v5244_v53  ;;  %v8577_v18 = vpop.permute.xlu1 %5328 }
 0x250   : > { %v5411_v23 = vmul.f32 %v6981_v17, %v5234_v48  ;;  %v6983_v24 = vadd.f32 %v4947_v20, %v2122_v47 }
 0x251   : > { %v5414_v26 = vmul.f32 %v6982_v19, %v5249_v57  ;;  %v5670_v39 = vmul.f32 %v5413_v5, %v5413_v5 }
 0x252   : > { %v5412_v27 = vmul.f32 %v6983_v24, %v5239_v54  ;;  %v5668_v29 = vmul.f32 %v5411_v23, %v5411_v23  ;;  %v8579_v24 = vpop.permute.xlu0 %5333 }
 0x253   : > { %v6366_v28 = vpack.c.bf16 %v5414_v26, %v5413_v5  ;;  %v5671_v44 = vmul.f32 %v5414_v26, %v5414_v26 }
 0x254   : > { %v6361_v30 = vpack.c.bf16 %v5412_v27, %v5411_v23  ;;  %v5627_v31 = vadd.f32 %v5412_v27, %v5411_v23  ;;  %v5669_v35 = vmul.f32 %v5412_v27, %v5412_v27  ;;  %v6948_v36 = vpop.f32.mrb[4].mxu0 }
 0x255   : > { %6448 = vst [vmem:[%s8567_s26 + $0x8] sm:$0xff] %v6366_v28   ;;  %v6984_v32 = vadd.f32 %v6948_v36, %v6758_v49  ;;  %v4960_v37 = vpop.f32.mrb[5].mxu0 }
 0x256   : > { %6362 = vst [vmem:[%s8567_s26] sm:$0xff] %v6361_v30   ;;  %v5628_v40 = vadd.f32 %v5627_v31, %v5413_v5  ;;  %v5704_v41 = vadd.f32 %v5669_v35, %v5668_v29  ;;  %v6985_v42 = vadd.f32 %v4960_v37, %v2135_v50  ;;  %v6949_v43 = vpop.f32.mrb[6].mxu0 }
 0x257   : > { %v6986_v45 = vadd.f32 %v6949_v43, %v6759_v51  ;;  %v4963_v46 = vpop.f32.mrb[7].mxu0  ;;  %v5417_v54 = vmul.f32 %v6984_v32, %v5264_v63  ;;  %v8595_v43 = vpop.permute.xlu0 %5343 }
 0x258   : > { %v5705_v47 = vadd.f32 %v5704_v41, %v5670_v39  ;;  %v5415_v48 = vmul.f32 %v6985_v42, %v5254_v59  ;;  %v5629_v53 = vadd.f32 %v5628_v40, %v5414_v26  ;;  %v6987_v49 = vadd.f32 %v4963_v46, %v8520_v52  ;;  %v8590_v39 = vpop.permute.xlu1 %5338 }
 0x259   : > { %v5418_v57 = vmul.f32 %v6986_v45, %v5269_v3  ;;  %v5674_v3 = vmul.f32 %v5417_v54, %v5417_v54 }
 0x25a   : > { %v5630_v14 = vadd.f32 %v5629_v53, %v5415_v48  ;;  %v5672_v15 = vmul.f32 %v5415_v48, %v5415_v48  ;;  %v5706_v16 = vadd.f32 %v5705_v47, %v5671_v44  ;;  %v5416_v50 = vmul.f32 %v6987_v49, %v8530_v61 }
 0x25b   : > { %v6376_v17 = vpack.c.bf16 %v5418_v57, %v5417_v54  ;;  %v5675_v28 = vmul.f32 %v5418_v57, %v5418_v57 }
 0x25c   : > { %v5707_v19 = vadd.f32 %v5706_v16, %v5672_v15  ;;  %v6371_v51 = vpack.c.bf16 %v5416_v50, %v5415_v48  ;;  %v5631_v20 = vadd.f32 %v5630_v14, %v5416_v50  ;;  %v5673_v23 = vmul.f32 %v5416_v50, %v5416_v50  ;;  %v6952_v59 = vpop.f32.mrb[8].mxu0 }
 0x25d   : > { %6450 = vst [vmem:[%s8567_s26 + $0x18] sm:$0xff] %v6376_v17   ;;  %v6988_v52 = vadd.f32 %v6952_v59, %v8522_v55  ;;  %v4976_v63 = vpop.f32.mrb[9].mxu0 }
 0x25e   : > { %6449 = vst [vmem:[%s8567_s26 + $0x10] sm:$0xff] %v6371_v51   ;;  %v5632_v5 = vadd.f32 %v5631_v20, %v5417_v54  ;;  %v5708_v26 = vadd.f32 %v5707_v19, %v5673_v23  ;;  %v6989_v61 = vadd.f32 %v4976_v63, %v8524_v56  ;;  %v6953_v27 = vpop.f32.mrb[10].mxu0 }
 0x25f   : > { %v6990_v29 = vadd.f32 %v6953_v27, %v8526_v58  ;;  %v4979_v30 = vpop.f32.mrb[11].mxu0  ;;  %v5421_v55 = vmul.f32 %v6988_v52, %v8552_v10  ;;  %v8612_v52 = vpop.permute.xlu1 %5348 }
 0x260   : > { %v5709_v31 = vadd.f32 %v5708_v26, %v5674_v3  ;;  %v5419_v35 = vmul.f32 %v6989_v61, %v8540_v34  ;;  %v5633_v36 = vadd.f32 %v5632_v5, %v5418_v57  ;;  %v6991_v32 = vadd.f32 %v4979_v30, %v8528_v60  ;;  %v8617_v26 = vpop.permute.xlu0 %5353 }
 0x261   : > { %v5422_v37 = vmul.f32 %v6990_v29, %v8554_v11  ;;  %v5678_v49 = vmul.f32 %v5421_v55, %v5421_v55 }
 0x262   : > { %v5634_v40 = vadd.f32 %v5633_v36, %v5419_v35  ;;  %v5676_v56 = vmul.f32 %v5419_v35, %v5419_v35  ;;  %v5710_v41 = vadd.f32 %v5709_v31, %v5675_v28  ;;  %v5420_v42 = vmul.f32 %v6991_v32, %v8550_v9 }
 0x263   : > { %v6386_v34 = vpack.c.bf16 %v5422_v37, %v5421_v55  ;;  %v5679_v16 = vmul.f32 %v5422_v37, %v5422_v37 }
 0x264   : > { %v5711_v60 = vadd.f32 %v5710_v41, %v5676_v56  ;;  %v6381_v10 = vpack.c.bf16 %v5420_v42, %v5419_v35  ;;  %v5635_v45 = vadd.f32 %v5634_v40, %v5420_v42  ;;  %v5677_v11 = vmul.f32 %v5420_v42, %v5420_v42  ;;  %v6956_v46 = vpop.f32.mrb[12].mxu0 }
 0x265   : > { %v8593_v58 = vpop.f32.mrb[20].mxu1  ;;  %6452 = vst [vmem:[%s8567_s26 + $0x28] sm:$0xff] %v6386_v34   ;;  %v6992_v48 = vadd.f32 %v6956_v46, %v8532_v62  ;;  %v4992_v53 = vpop.f32.mrb[13].mxu0 }
 0x266   : > { %v8597_v44 = vpop.f32.mrb[21].mxu1  ;;  %6451 = vst [vmem:[%s8567_s26 + $0x20] sm:$0xff] %v6381_v10   ;;  %v5636_v54 = vadd.f32 %v5635_v45, %v5421_v55  ;;  %v5712_v57 = vadd.f32 %v5711_v60, %v5677_v11  ;;  %v6993_v14 = vadd.f32 %v4992_v53, %v8534_v0  ;;  %v6957_v15 = vpop.f32.mrb[14].mxu0 }
 0x267   : > { %v8599_v47 = vpop.f32.mrb[22].mxu1  ;;  %v6994_v50 = vadd.f32 %v6957_v15, %v8536_v1  ;;  %v4995_v17 = vpop.f32.mrb[15].mxu0  ;;  %v5425_v23 = vmul.f32 %v6992_v48, %v8560_v13 }
 0x268   : > { %v8603_v9 = vpop.f32.mrb[23].mxu1  ;;  %v5713_v19 = vadd.f32 %v5712_v57, %v5678_v49  ;;  %v5423_v51 = vmul.f32 %v6993_v14, %v8556_v12  ;;  %v5637_v20 = vadd.f32 %v5636_v54, %v5422_v37  ;;  %v6995_v62 = vadd.f32 %v4995_v17, %v8538_v2  ;;  %v8634_v11 = vpop.permute.xlu1 %5358 }
 0x269   : > { %v5426_v59 = vmul.f32 %v6994_v50, %v8563_v21  ;;  %v5682_v35 = vmul.f32 %v5425_v23, %v5425_v23  ;;  %v5364_v49 = vpop.permute.xlu0 %5363 }
 0x26a   : > { %v5638_v63 = vadd.f32 %v5637_v20, %v5423_v51  ;;  %v5680_v0 = vmul.f32 %v5423_v51, %v5423_v51  ;;  %v5714_v3 = vadd.f32 %v5713_v19, %v5679_v16  ;;  %v5424_v5 = vmul.f32 %v6995_v62, %v8558_v22 }
 0x26b   : > { %v6396_v12 = vpack.c.bf16 %v5426_v59, %v5425_v23  ;;  %v5683_v40 = vmul.f32 %v5426_v59, %v5426_v59 }
 0x26c   : > { %v5715_v2 = vadd.f32 %v5714_v3, %v5680_v0  ;;  %v6391_v13 = vpack.c.bf16 %v5424_v5, %v5423_v51  ;;  %v5639_v27 = vadd.f32 %v5638_v63, %v5424_v5  ;;  %v5681_v21 = vmul.f32 %v5424_v5, %v5424_v5  ;;  %v6960_v28 = vpop.f32.mrb[16].mxu0  ;;  %v5369_v0 = vpop.permute.xlu1 %5368 }
 0x26d   : > { %v8615_v1 = vpop.f32.mrb[24].mxu1  ;;  %6454 = vst [vmem:[%s8567_s26 + $0x38] sm:$0xff] %v6396_v12   ;;  %v6996_v30 = vadd.f32 %v6960_v28, %v8542_v4  ;;  %v5008_v31 = vpop.f32.mrb[17].mxu0 }
 0x26e   : > { %v8619_v61 = vpop.f32.mrb[25].mxu1  ;;  %6453 = vst [vmem:[%s8567_s26 + $0x30] sm:$0xff] %v6391_v13   ;;  %v5640_v36 = vadd.f32 %v5639_v27, %v5425_v23  ;;  %v5716_v32 = vadd.f32 %v5715_v2, %v5681_v21  ;;  %v6997_v55 = vadd.f32 %v5008_v31, %v8544_v6  ;;  %v6961_v37 = vpop.f32.mrb[18].mxu0 }
 0x26f   : > { %v8621_v29 = vpop.f32.mrb[26].mxu1  ;;  %v6998_v56 = vadd.f32 %v6961_v37, %v8546_v7  ;;  %v5011_v41 = vpop.f32.mrb[19].mxu0  ;;  %v5429_v10 = vmul.f32 %v6996_v30, %v8573_v33 }
 0x270   : > { %v8625_v22 = vpop.f32.mrb[27].mxu1  ;;  %v5717_v42 = vadd.f32 %v5716_v32, %v5682_v35  ;;  %v5427_v34 = vmul.f32 %v6997_v55, %v8565_v25  ;;  %v5641_v60 = vadd.f32 %v5640_v36, %v5426_v59  ;;  %v6999_v4 = vadd.f32 %v5011_v41, %v8548_v8 }
 0x271   : > { %v5430_v45 = vmul.f32 %v6998_v56, %v8577_v18 }
 0x272   : > { %v5642_v46 = vadd.f32 %v5641_v60, %v5427_v34  ;;  %v5684_v6 = vmul.f32 %v5427_v34, %v5427_v34  ;;  %v5718_v48 = vadd.f32 %v5717_v42, %v5683_v40  ;;  %v5428_v53 = vmul.f32 %v6999_v4, %v8570_v38 }
 0x273   : > { %v6406_v25 = vpack.c.bf16 %v5430_v45, %v5429_v10  ;;  %v5686_v38 = vmul.f32 %v5429_v10, %v5429_v10  ;;  %v5687_v23 = vmul.f32 %v5430_v45, %v5430_v45 }
 0x274   : > { %v5719_v8 = vadd.f32 %v5718_v48, %v5684_v6  ;;  %v6401_v57 = vpack.c.bf16 %v5428_v53, %v5427_v34  ;;  %v5643_v33 = vadd.f32 %v5642_v46, %v5428_v53  ;;  %v5685_v14 = vmul.f32 %v5428_v53, %v5428_v53  ;;  %v6964_v18 = vpop.f32.mrb[20].mxu0 }
 0x275   : > { %v8637_v7 = vpop.f32.mrb[28].mxu1  ;;  %6456 = vst [vmem:[%s8567_s26 + $0x48] sm:$0xff] %v6406_v25   ;;  %v7000_v16 = vadd.f32 %v6964_v18, %v8593_v58  ;;  %v5024_v50 = vpop.f32.mrb[21].mxu0 }
 0x276   : > { %v8639_v54 = vpop.f32.mrb[29].mxu1  ;;  %6455 = vst [vmem:[%s8567_s26 + $0x40] sm:$0xff] %v6401_v57   ;;  %v5644_v19 = vadd.f32 %v5643_v33, %v5429_v10  ;;  %v5720_v51 = vadd.f32 %v5719_v8, %v5685_v14  ;;  %v7001_v20 = vadd.f32 %v5024_v50, %v8597_v44  ;;  %v6965_v62 = vpop.f32.mrb[22].mxu0 }
 0x277   : > { %v8641_v15 = vpop.f32.mrb[30].mxu1  ;;  %v7002_v59 = vadd.f32 %v6965_v62, %v8599_v47  ;;  %v5027_v63 = vpop.f32.mrb[23].mxu0  ;;  %v5433_v2 = vmul.f32 %v7000_v16, %v8595_v43 }
 0x278   : > { %v8645_v17 = vpop.f32.mrb[31].mxu1  ;;  %v5721_v3 = vadd.f32 %v5720_v51, %v5686_v38  ;;  %v5431_v5 = vmul.f32 %v7001_v20, %v8579_v24  ;;  %v5645_v12 = vadd.f32 %v5644_v19, %v5430_v45  ;;  %v7003_v58 = vadd.f32 %v5027_v63, %v8603_v9  ;;  %v5374_v47 = vpop.permute.xlu0 %5373 }
 0x279   : > { %v5434_v13 = vmul.f32 %v7002_v59, %v8612_v52  ;;  %v5690_v56 = vmul.f32 %v5433_v2, %v5433_v2 }
 0x27a   : > { %v5646_v27 = vadd.f32 %v5645_v12, %v5431_v5  ;;  %v5688_v21 = vmul.f32 %v5431_v5, %v5431_v5  ;;  %v5722_v44 = vadd.f32 %v5721_v3, %v5687_v23  ;;  %v5432_v28 = vmul.f32 %v7003_v58, %v8590_v39  ;;  %v5379_v39 = vpop.permute.xlu1 %5378 }
 0x27b   : > { %v6416_v31 = vpack.c.bf16 %v5434_v13, %v5433_v2  ;;  %v5691_v4 = vmul.f32 %v5434_v13, %v5434_v13 }
 0x27c   : > { %v5723_v24 = vadd.f32 %v5722_v44, %v5688_v21  ;;  %v6411_v36 = vpack.c.bf16 %v5432_v28, %v5431_v5  ;;  %v5647_v9 = vadd.f32 %v5646_v27, %v5432_v28  ;;  %v5689_v32 = vmul.f32 %v5432_v28, %v5432_v28  ;;  %v6968_v43 = vpop.f32.mrb[24].mxu0  ;;  %v5384_v14 = vpop.permute.xlu0 %5383 }
 0x27d   : > { %v8655_v30 = vpop.f32.mrb[32].mxu1  ;;  %6458 = vst [vmem:[%s8567_s26 + $0x58] sm:$0xff] %v6416_v31   ;;  %v7004_v52 = vadd.f32 %v6968_v43, %v8615_v1  ;;  %v5040_v37 = vpop.f32.mrb[25].mxu0 }
 0x27e   : > { %v8657_v35 = vpop.f32.mrb[33].mxu1  ;;  %6457 = vst [vmem:[%s8567_s26 + $0x50] sm:$0xff] %v6411_v36   ;;  %v5648_v41 = vadd.f32 %v5647_v9, %v5433_v2  ;;  %v5724_v42 = vadd.f32 %v5723_v24, %v5689_v32  ;;  %v7005_v34 = vadd.f32 %v5040_v37, %v8619_v61  ;;  %v6969_v60 = vpop.f32.mrb[26].mxu0 }
 0x27f   : > { %v8659_v55 = vpop.f32.mrb[34].mxu1  ;;  %v7006_v10 = vadd.f32 %v6969_v60, %v8621_v29  ;;  %v5043_v45 = vpop.f32.mrb[27].mxu0  ;;  %v5437_v53 = vmul.f32 %v7004_v52, %v5364_v49 }
 0x280   : > { %v8663_v40 = vpop.f32.mrb[35].mxu1  ;;  %v5725_v46 = vadd.f32 %v5724_v42, %v5690_v56  ;;  %v5435_v6 = vmul.f32 %v7005_v34, %v8617_v26  ;;  %v5649_v48 = vadd.f32 %v5648_v41, %v5434_v13  ;;  %v7007_v1 = vadd.f32 %v5043_v45, %v8625_v22  ;;  %v5389_v16 = vpop.permute.xlu1 %5388 }
 0x281   : > { %v5438_v25 = vmul.f32 %v7006_v10, %v5369_v0  ;;  %v5694_v49 = vmul.f32 %v5437_v53, %v5437_v53  ;;  %v5394_v13 = vpop.permute.xlu0 %5393 }
 0x282   : > { %v5650_v8 = vadd.f32 %v5649_v48, %v5435_v6  ;;  %v5692_v57 = vmul.f32 %v5435_v6, %v5435_v6  ;;  %v5726_v33 = vadd.f32 %v5725_v46, %v5691_v4  ;;  %v5436_v61 = vmul.f32 %v7007_v1, %v8634_v11 }
 0x283   : > { %v6426_v18 = vpack.c.bf16 %v5438_v25, %v5437_v53  ;;  %v5695_v11 = vmul.f32 %v5438_v25, %v5438_v25 }
 0x284   : > { %v5727_v29 = vadd.f32 %v5726_v33, %v5692_v57  ;;  %v6421_v50 = vpack.c.bf16 %v5436_v61, %v5435_v6  ;;  %v5651_v38 = vadd.f32 %v5650_v8, %v5436_v61  ;;  %v5693_v19 = vmul.f32 %v5436_v61, %v5436_v61  ;;  %v6972_v26 = vpop.f32.mrb[28].mxu0  ;;  %v5399_v27 = vpop.permute.xlu1 %5398 }
 0x285   : > { %6460 = vst [vmem:[%s8567_s26 + $0x68] sm:$0xff] %v6426_v18   ;;  %v7008_v51 = vadd.f32 %v6972_v26, %v8637_v7  ;;  %v5056_v22 = vpop.f32.mrb[29].mxu0  ;;  %v5404_v60 = vpop.permute.xlu0 %5403 }
 0x286   : > { %6459 = vst [vmem:[%s8567_s26 + $0x60] sm:$0xff] %v6421_v50   ;;  %v5652_v20 = vadd.f32 %v5651_v38, %v5437_v53  ;;  %v5728_v62 = vadd.f32 %v5727_v29, %v5693_v19  ;;  %v7009_v23 = vadd.f32 %v5056_v22, %v8639_v54  ;;  %v6973_v59 = vpop.f32.mrb[30].mxu0 }
 0x287   : > { %v7010_v63 = vadd.f32 %v6973_v59, %v8641_v15  ;;  %v5059_v0 = vpop.f32.mrb[31].mxu0  ;;  %v5441_v2 = vmul.f32 %v7008_v51, %v5384_v14 }
 0x288   : > { %v5729_v3 = vadd.f32 %v5728_v62, %v5694_v49  ;;  %v5439_v5 = vmul.f32 %v7009_v23, %v5374_v47  ;;  %v5653_v12 = vadd.f32 %v5652_v20, %v5438_v25  ;;  %v7011_v58 = vadd.f32 %v5059_v0, %v8645_v17  ;;  %v5409_v4 = vpop.permute.xlu1 %5408 }
 0x289   : > { %v5442_v7 = vmul.f32 %v7010_v63, %v5389_v16  ;;  %v5698_v17 = vmul.f32 %v5441_v2, %v5441_v2 }
 0x28a   : > { %v5654_v21 = vadd.f32 %v5653_v12, %v5439_v5  ;;  %v5696_v44 = vmul.f32 %v5439_v5, %v5439_v5  ;;  %v5730_v28 = vadd.f32 %v5729_v3, %v5695_v11  ;;  %v5440_v54 = vmul.f32 %v7011_v58, %v5379_v39 }
 0x28b   : > { %v6436_v31 = vpack.c.bf16 %v5442_v7, %v5441_v2  ;;  %v5699_v39 = vmul.f32 %v5442_v7, %v5442_v7 }
 0x28c   : > { %v5731_v24 = vadd.f32 %v5730_v28, %v5696_v44  ;;  %v6431_v36 = vpack.c.bf16 %v5440_v54, %v5439_v5  ;;  %v5655_v15 = vadd.f32 %v5654_v21, %v5440_v54  ;;  %v5697_v9 = vmul.f32 %v5440_v54, %v5440_v54  ;;  %v6976_v32 = vpop.f32.mrb[32].mxu0 }
 0x28d   : > { %6462 = vst [vmem:[%s8567_s26 + $0x78] sm:$0xff] %v6436_v31   ;;  %v7012_v47 = vadd.f32 %v6976_v32, %v8655_v30  ;;  %v5072_v43 = vpop.f32.mrb[33].mxu0 }
 0x28e   : > { %6461 = vst [vmem:[%s8567_s26 + $0x70] sm:$0xff] %v6431_v36   ;;  %v5656_v52 = vadd.f32 %v5655_v15, %v5441_v2  ;;  %v5732_v37 = vadd.f32 %v5731_v24, %v5697_v9  ;;  %v7013_v56 = vadd.f32 %v5072_v43, %v8657_v35  ;;  %v6977_v41 = vpop.f32.mrb[34].mxu0 }
 0x28f   : > { %v7014_v42 = vadd.f32 %v6977_v41, %v8659_v55  ;;  %v5075_v34 = vpop.f32.mrb[35].mxu0  ;;  %v5445_v6 = vmul.f32 %v7012_v47, %v5404_v60 }
 0x290   : > { %v5733_v10 = vadd.f32 %v5732_v37, %v5698_v17  ;;  %v5443_v45 = vmul.f32 %v7013_v56, %v5394_v13  ;;  %v5657_v46 = vadd.f32 %v5656_v52, %v5442_v7  ;;  %v7015_v30 = vadd.f32 %v5075_v34, %v8663_v40 }
 0x291   : > { %v5446_v48 = vmul.f32 %v7014_v42, %v5409_v4  ;;  %v5702_v61 = vmul.f32 %v5445_v6, %v5445_v6 }
 0x292   : > { %v5658_v1 = vadd.f32 %v5657_v46, %v5443_v45  ;;  %v5700_v35 = vmul.f32 %v5443_v45, %v5443_v45  ;;  %v5734_v53 = vadd.f32 %v5733_v10, %v5699_v39  ;;  %v5444_v25 = vmul.f32 %v7015_v30, %v5399_v27 }
 0x293   : > { %v6446_v55 = vpack.c.bf16 %v5446_v48, %v5445_v6 }
 0x294   : > { %v5735_v8 = vadd.f32 %v5734_v53, %v5700_v35  ;;  %v6441_v57 = vpack.c.bf16 %v5444_v25, %v5443_v45  ;;  %v5659_v40 = vadd.f32 %v5658_v1, %v5444_v25  ;;  %v5701_v33 = vmul.f32 %v5444_v25, %v5444_v25 }
 0x295   : > { %6464 = vst [vmem:[%s8567_s26 + $0x88] sm:$0xff] %v6446_v55  }
 0x296   : > { %6463 = vst [vmem:[%s8567_s26 + $0x80] sm:$0xff] %v6441_v57   ;;  %v5660_v14 = vadd.f32 %v5659_v40, %v5445_v6  ;;  %v5736_v18 = vadd.f32 %v5735_v8, %v5701_v33 }
 0x297   : > { %7641 = shalt.err (!%p7638_p2)
}
 0x298   : > { %s7642_s12 = scalar_lea.hbm %s8690_s9, 2304  ;;  %s7646_s26 = scalar_lea.hbm %s8809_s3, 4608 }
 0x299   : > { %p7643_p13 = scmp.ne.s32.totalorder %s8690_s9, %s7642_s12  ;;  %p7647_p4 = scmp.lt.u32.totalorder %s8690_s9, %s8809_s3 }
 0x29a   : > { %p7648_p7 = scmp.lt.u32.totalorder %s7646_s26, %s7642_s12  ;;  %p7650_p11 = scmp.lt.u32.totalorder %s7642_s12, %s8690_s9 }
 0x29b   : > { %p7644_p6 = pnand %p7643_p13, %p8825_p0 }
 0x29c   : > { %p7649_p8 = por %p7648_p7, %p7647_p4 }
 0x29d   : > { %p7645_p10 = pneg %p7644_p6 }
 0x29e   : > { %p7651_p1 = por %p7650_p11, %p7649_p8 }
 0x2a0   : > { %p7652_p3 = pnand %p7651_p1, %p7645_p10 }
 0x2a2   : > { %7655 = shalt.err (!%p7652_p3)
}
 0x2a3   : > { %s7771_s15 = smov 64   ;;  %s7772_s27 = smov 4   ;;  %v5703_v16 = vmul.f32 %v5446_v48, %v5446_v48  ;;  %v5661_v29 = vadd.f32 %v5660_v14, %v5446_v48  ;;  %v5737_v50 = vadd.f32 %v5736_v18, %v5702_v61 }
 0x2a4   : > { %7293 = dma.vmem_to_hbm [thread:$0]  (%p8825_p0), %s8685_s28, 2304, %s8690_s9, %s5748_s13, %s7771_s15, %s7771_s15, %s7772_s27  }
 0x2a5   : > { %v5662_v38 = vrot.slane %v5661_v29, 4  ;;  %v5738_v19 = vadd.f32 %v5737_v50, %v5703_v16  ;;  %s5752_s16 = sand.u32 1, %s7826_s22   ;;  %s6318_s30 = sshll.u32 %s7826_s22, 4 }
 0x2a6   : > { %s281_s11 = scalar_lea.vmem [#allocation10], %s7979_s6  ;;  %s287_s28 = scalar_lea.vmem [#allocation12], %s7979_s6 }
 0x2a7   : > { %v5663_v26 = vadd.f32 %v5662_v38, %v5661_v29  ;;  %v5739_v51 = vrot.slane %v5738_v19, 4  ;;  %s5785_s12 = sshll.u32 %s281_s11, 4  ;;  %s5798_s9 = sshll.u32 %s287_s28, 4  ;;  %s8729_s12 = int_to_ptr.vmem [resolvable:$true] %s5785_s12  ;;  %s8736_s9 = int_to_ptr.vmem [resolvable:$true] %s5798_s9 }
 0x2a8   : > { %s8727_s24 = scalar_lea.hbm %s8810_s4, %s6318_s30  ;;  %s8734_s10 = scalar_lea.hbm %s8811_s5, %s6318_s30 }
 0x2a9   : > { %v5740_v22 = vadd.f32 %v5739_v51, %v5738_v19  ;;  %v5664_v49 = vrot.slane %v5663_v26, 2  ;;  %s8738_s14 = scalar_lea.sflag [#allocation11], %s5752_s16  ;;  %s7656_s15 = scalar_lea.vmem %s8729_s12, 16 }
 0x2aa   : > { %p7657_p5 = scmp.ne.s32.totalorder %s8729_s12, %s7656_s15  ;;  %s7773_s27 = smov [#allocation10]  }
 0x2ab   : > { %v5665_v20 = vadd.f32 %v5664_v49, %v5663_v26  ;;  %v5741_v62 = vrot.slane %v5740_v22, 2  ;;  %s7660_s13 = sshll.u32 %s7773_s27, 4  ;;  %s7661_s13 = int_to_ptr.vmem [resolvable:$false] %s7660_s13 }
 0x2ac   : > { %p7658_p9 = pnand %p7657_p5, %p8825_p0  ;;  %s7662_s29 = scalar_lea.vmem %s7661_s13, 32 }
 0x2ad   : > { %v5666_v23 = vrot.slane %v5665_v20, 1  ;;  %v5742_v59 = vadd.f32 %v5741_v62, %v5740_v22  ;;  %p7663_p2 = scmp.lt.s32.totalorder %s8729_s12, %s7661_s13  ;;  %p7664_p13 = scmp.lt.s32.totalorder %s7662_s29, %s7656_s15 }
 0x2ae   : > { %p7659_p12 = pneg %p7658_p9 }
 0x2af   : > { %v5667_v11 = vadd.f32 %v5666_v23, %v5665_v20  ;;  %v5743_v63 = vrot.slane %v5742_v59, 1  ;;  %p7665_p6 = por %p7664_p13, %p7663_p2 }
 0x2b1   : > { %5745 = vst [vmem:[%s281_s11] sm:$0x1] %v5667_v11  ;;  %v5744_v0 = vadd.f32 %v5743_v63, %v5742_v59  ;;  %p7666_p10 = pnand %p7665_p6, %p7659_p12 }
 0x2b3   : > { %7669 = shalt.err (!%p7666_p10)
}
 0x2b4   : > { %s7670_s16 = scalar_lea.hbm %s8727_s24, 16  ;;  %s7674_s22 = scalar_lea.hbm %s8810_s4, 32 }
 0x2b5   : > { %p7671_p4 = scmp.ne.s32.totalorder %s8727_s24, %s7670_s16  ;;  %p7675_p11 = scmp.lt.u32.totalorder %s8727_s24, %s8810_s4 }
 0x2b6   : > { %p7676_p1 = scmp.lt.u32.totalorder %s7674_s22, %s7670_s16  ;;  %p7678_p5 = scmp.lt.u32.totalorder %s7670_s16, %s8727_s24 }
 0x2b7   : > { %p7672_p7 = pnand %p7671_p4, %p8825_p0 }
 0x2b8   : > { %p7677_p3 = por %p7676_p1, %p7675_p11 }
 0x2b9   : > { %p7673_p8 = pneg %p7672_p7 }
 0x2ba   : > { %p7679_p9 = por %p7678_p5, %p7677_p3 }
 0x2bc   : > { %p7680_p12 = pnand %p7679_p9, %p7673_p8 }
 0x2be   : > { %7683 = shalt.err (!%p7680_p12)
}
 0x2bf   : > { %7294 = dma.vmem_to_hbm [thread:$0]  (%p8825_p0), %s8729_s12, 16, %s8727_s24, %s8738_s14   ;;  %5746 = vst [vmem:[%s287_s28] sm:$0x1] %v5744_v0 }
 0x2c0   : > { %s7684_s15 = scalar_lea.vmem %s8736_s9, 16  ;;  %s7774_s13 = smov [#allocation12]  }
 0x2c1   : > { %p7685_p2 = scmp.ne.s32.totalorder %s8736_s9, %s7684_s15  ;;  %s7688_s29 = sshll.u32 %s7774_s13, 4  ;;  %s7689_s29 = int_to_ptr.vmem [resolvable:$false] %s7688_s29 }
 0x2c2   : > { %s7690_s16 = scalar_lea.vmem %s7689_s29, 32  ;;  %p7691_p10 = scmp.lt.s32.totalorder %s8736_s9, %s7689_s29 }
 0x2c3   : > { %p7686_p13 = pnand %p7685_p2, %p8825_p0  ;;  %p7692_p4 = scmp.lt.s32.totalorder %s7690_s16, %s7684_s15 }
 0x2c5   : > { %p7687_p6 = pneg %p7686_p13  ;;  %p7693_p7 = por %p7692_p4, %p7691_p10 }
 0x2c7   : > { %p7694_p8 = pnand %p7693_p7, %p7687_p6 }
 0x2c9   : > { %7697 = shalt.err (!%p7694_p8)
}
 0x2ca   : > { %s7698_s6 = scalar_lea.hbm %s8734_s10, 16  ;;  %s7702_s24 = scalar_lea.hbm %s8811_s5, 32 }
 0x2cb   : > { %p7699_p11 = scmp.ne.s32.totalorder %s8734_s10, %s7698_s6  ;;  %p7703_p5 = scmp.lt.u32.totalorder %s8734_s10, %s8811_s5 }
 0x2cc   : > { %p7704_p9 = scmp.lt.u32.totalorder %s7702_s24, %s7698_s6  ;;  %p7706_p2 = scmp.lt.u32.totalorder %s7698_s6, %s8734_s10 }
 0x2cd   : > { %p7700_p1 = pnand %p7699_p11, %p8825_p0 }
 0x2ce   : > { %p7705_p12 = por %p7704_p9, %p7703_p5 }
 0x2cf   : > { %p7701_p3 = pneg %p7700_p1 }
 0x2d0   : > { %p7707_p13 = por %p7706_p2, %p7705_p12 }
 0x2d2   : > { %p7708_p6 = pnand %p7707_p13, %p7701_p3 }
 0x2d4   : > { %7711 = shalt.err (!%p7708_p6)
}
 0x2d5   : > { %7295 = dma.vmem_to_hbm [thread:$0]  (%p8825_p0), %s8736_s9, 16, %s8734_s10, %s8738_s14  }
 0x2d6 PF: > { %s5810_s22 = sand.u32 1, %s7746_s18   ;;  %p8826_p10 = scmp.ne.s32.totalorder %s8816_s25, 0 }
 0x2d7   : > { %p8827_p4 = scmp.ge.s32.totalorder %s7758_s21, 2  ;;  %s5811_s26 = scalar_lea.sflag [#allocation5], %s5810_s22 }
 0x2d9   : > { %p7311_p7 = pnand %p8827_p4, %p8826_p10 }
 0x2db   : > { %7737 = dma.done.wait (!%p7311_p7), %s5811_s26, 2304  }
 0x2dc   : > { %7739 = vsyncadd (!%p7311_p7), %s5811_s26, 4294964992  ;;  %s5819_s27 = sand.u32 1, %s5940_s23  }
 0x2dd   : > { %s5820_s15 = scalar_lea.sflag [#allocation11], %s5819_s27 }
 0x2de   : > { %7741 = dma.done.wait (!%p7311_p7), %s5820_s15, 32  }
 0x2df   : > { %7743 = vsyncadd (!%p7311_p7), %s5820_s15, 4294967264  ;;  %p23_p0 = scmp.ge.s32.totalorder %s7917_s17, 4   ;;  %s8828_s18 = smov %s7750_s19 }
 0x2e0   : > { %s8829_s19 = smov %s7754_s20  ;;  %s8830_s20 = smov %s7926_s7 }
 0x2e1   : > { %s8831_s21 = smov %s7917_s17  ;;  %25 = sbr.rel (!%p23_p0) target bundleno = 8 (0x8), region = 125 }
 0x2e8   :  { %5832 = vsyncpa [#allocation4], 1 }
 0x2e9   :  { %5834 = vsyncpa [#allocation4 + $0x1], 1 }
 0x2ea   :  { %5835 = vsyncpa [#allocation7], 1 }
 0x2eb   :  { %5836 = vsyncpa [#allocation5], 1 }
 0x2ec   :  { %5838 = vsyncpa [#allocation5 + $0x1], 1 }
 0x2ed   :  { %5839 = vsyncpa [#allocation11], 1 }
 0x2ee   :  { %5841 = vsyncpa [#allocation11 + $0x1], 1 }

</bundles_post_ra>
